<compile_context>
chip_gen: v7x
topology: tpu7x:2x2x1
jax: 0.10.0
libtpu: 0.0.40
codegen_flags: <defaults>
</compile_context>

<pallas_src>
import jax
import jax.numpy as jnp
import numpy as np
from jax.experimental import pallas as pl
from jax.experimental.pallas import tpu as pltpu


def _round_up(x, m):
    return ((x + m - 1) // m) * m


def _make_bow_kernel(num_hidden_layers):
    """Kernel: MLP (once per batch tile) -> online log_softmax over vocab tiles -> row loss."""
    n_w = 3 + 2 * (num_hidden_layers - 1) + 2   # Wy, Wz, b0, (W_l, b_l)*, W_out, b_out

    def kernel(*refs):
        y_ref, z_ref, t_ref, inv_den_ref = refs[0], refs[1], refs[2], refs[3]
        w_refs = refs[4:4 + n_w]
        out_ref = refs[4 + n_w]
        h_sc, m_sc, l_sc, st_sc = refs[4 + n_w + 1:]

        j = pl.program_id(1)
        nv = pl.num_programs(1)

        # ---- once per batch tile: run hidden MLP, reset online-softmax accumulators ----
        @pl.when(j == 0)
        def _():
            h = (jnp.dot(y_ref[...], w_refs[0][...],
                         preferred_element_type=jnp.float32)
                 + jnp.dot(z_ref[...], w_refs[1][...],
                           preferred_element_type=jnp.float32)
                 + w_refs[2][...])
            h = jnp.maximum(h, 0.0)
            for l in range(1, num_hidden_layers):
                w = w_refs[3 + 2 * (l - 1)][...]
                b = w_refs[4 + 2 * (l - 1)][...]
                h = jnp.dot(h.astype(w.dtype), w,
                            preferred_element_type=jnp.float32) + b
                h = jnp.maximum(h, 0.0)
            h_sc[...] = h.astype(h_sc.dtype)                 # resident bf16 activations
            m_sc[...] = jnp.full(m_sc.shape, -jnp.inf, m_sc.dtype)
            l_sc[...] = jnp.zeros(l_sc.shape, l_sc.dtype)
            st_sc[...] = jnp.zeros(st_sc.shape, st_sc.dtype)

        # ---- per vocab tile: logits + online log-sum-exp statistics ----
        w_out = w_refs[n_w - 2][0]                           # (Hp, tv) from pre-tiled (nv, Hp, tv)
        b_out = w_refs[n_w - 1][...]                         # (1, tv) f32 (-1e30 on padded cols)
        logits = (jnp.dot(h_sc[...], w_out,
                          preferred_element_type=jnp.float32) + b_out)   # (tm, tv) f32
        t = t_ref[...].astype(jnp.float32)                   # int8 counts -> f32 (exact)

        m_old = m_sc[...]
        m_new = jnp.maximum(m_old, jnp.max(logits, axis=-1, keepdims=True))
        l_sc[...] = (jnp.exp(m_old - m_new) * l_sc[...]
                     + jnp.sum(jnp.exp(logits - m_new), axis=-1, keepdims=True))
        m_sc[...] = m_new
        st_sc[...] = st_sc[...] + jnp.sum(t * logits, axis=-1, keepdims=True)

        # ---- finalize per-row loss after the last vocab tile ----
        #   sum(t * logp) = sum(t*logit) - lse * sum(t)
        #   row_loss = -(sum(t*logp) / sum(t)) = lse - sum(t*logit) / sum(t)
        @pl.when(j == nv - 1)
        def _():
            lse = m_sc[...] + jnp.log(l_sc[...])
            inv_den = inv_den_ref[...]                       # exact 1/sum(t); 0 on padded rows
            loss = lse - st_sc[...] * inv_den
            out_ref[...] = jnp.where(inv_den != 0.0, loss, 0.0).astype(out_ref.dtype)

    return kernel


def bag_of_words_loss(yvecs, zvecs, tgts, tgts_mask, params, *,
                      tv=1024, tm=None, tgt_dtype=jnp.int8):
    """Forward of decoders.bag_of_words. `params` = [(W, b), ...], W as (in, out).

    tgt_dtype=jnp.int8 assumes bag-of-words counts fit in int8 (|count| <= 127);
    pass tgt_dtype=jnp.float32 for arbitrary real-valued targets.
    """
    del tgts_mask  # unused by the PyTorch forward (kept for signature parity)

    B, ysize = yvecs.shape
    zsize = zvecs.shape[-1]
    V = tgts.shape[-1]
    L = len(params) - 1
    assert L >= 1, "need at least one hidden layer (mlp_layer >= 1)"
    H = params[0][0].shape[1]

    f32, bf16 = jnp.float32, jnp.bfloat16

    # ---- tile sizes ----
    # tm: multiple of 32 (int8 sublane tile), cap 512, but keep nb >= 2 when B >= 64
    # so both v7x TensorCores get work on the "parallel" batch axis.
    if tm is None:
        tm = min(_round_up(B, 32), 512)
        if B >= 64:
            tm = min(tm, _round_up((B + 1) // 2, 32))
    tm = _round_up(tm, 32)
    Bp = _round_up(B, tm)
    tv = max(128, _round_up(min(tv, _round_up(V, 128)), 128))
    Vp = _round_up(V, tv)
    Hp = _round_up(H, 128)
    nb, nv = Bp // tm, Vp // tv

    def pad2(a, rows, cols):
        return jnp.pad(a, ((0, rows - a.shape[0]), (0, cols - a.shape[1])))

    # Activations in bf16; targets as int8 counts (halves the dominant B*V HBM stream).
    y = pad2(yvecs.astype(bf16), Bp, ysize)
    z = pad2(zvecs.astype(bf16), Bp, zsize)
    t = pad2(tgts.astype(tgt_dtype), Bp, Vp)

    # Exact per-row normalizer computed once in the wrapper (removes one cross-lane
    # reduction per vocab step and the approx reciprocal). Padded rows get 0 -> loss 0.
    den = jnp.sum(tgts.astype(f32), axis=-1, keepdims=True)            # (B, 1)
    inv_den = jnp.where(den != 0.0, 1.0 / den, 0.0)
    inv_den = jnp.pad(inv_den, ((0, Bp - B), (0, 0)))                  # (Bp, 1)

    # First hidden layer: split the concat-weight into y / z halves so the
    # jnp.concatenate round trip through HBM disappears.
    W0, b0 = params[0]
    flat = [
        pad2(W0[:ysize].astype(bf16), ysize, Hp),
        pad2(W0[ysize:].astype(bf16), zsize, Hp),
        pad2(b0.reshape(1, -1).astype(f32), 1, Hp),
    ]
    for (w, b) in params[1:-1]:
        flat.append(pad2(w.astype(bf16), Hp, Hp))
        flat.append(pad2(b.reshape(1, -1).astype(f32), 1, Hp))

    # Output projection: pre-tile to a contiguous (nv, Hp, tv) layout so every vocab-tile
    # fetch is one contiguous DMA (instead of Hp short strided rows).
    W_out, b_out = params[-1]
    W_out_p = pad2(W_out.astype(bf16), Hp, Vp)                         # (Hp, Vp)
    W_out_tiled = W_out_p.reshape(Hp, nv, tv).transpose(1, 0, 2)       # (nv, Hp, tv)
    flat.append(W_out_tiled)
    # Padded vocab columns get a hugely negative bias so exp() == 0 in the softmax.
    flat.append(jnp.full((1, Vp), -1e30, f32).at[0, :V].set(b_out.astype(f32)))

    in_specs = [
        pl.BlockSpec((tm, ysize), lambda i, j: (i, 0)),
        pl.BlockSpec((tm, zsize), lambda i, j: (i, 0)),
        pl.BlockSpec((tm, tv), lambda i, j: (i, j)),
        pl.BlockSpec((tm, 1), lambda i, j: (i, 0)),
        pl.BlockSpec((ysize, Hp), lambda i, j: (0, 0)),
        pl.BlockSpec((zsize, Hp), lambda i, j: (0, 0)),
        pl.BlockSpec((1, Hp), lambda i, j: (0, 0)),
    ]
    for _ in range(L - 1):
        in_specs.append(pl.BlockSpec((Hp, Hp), lambda i, j: (0, 0)))
        in_specs.append(pl.BlockSpec((1, Hp), lambda i, j: (0, 0)))
    in_specs.append(pl.BlockSpec((1, Hp, tv), lambda i, j: (j, 0, 0)))   # pre-tiled W_out
    in_specs.append(pl.BlockSpec((1, tv), lambda i, j: (0, j)))

    # VMEM budget: <= 3/4 of physical (v7x: 48 MiB of 64; v5e/v6e: 96 of 128).
    vmem_limit = 64 * 1024 * 1024
    try:
        cap = pltpu.get_tpu_info().vmem_capacity_bytes
        vmem_limit = min(96 * 1024 * 1024, (cap * 3) // 4)
    except Exception:
        pass

    row_loss = pl.pallas_call(
        _make_bow_kernel(L),
        out_shape=jax.ShapeDtypeStruct((Bp, 1), f32),
        grid_spec=pltpu.PrefetchScalarGridSpec(
            num_scalar_prefetch=0,
            grid=(nb, nv),                          # vocab (reduction) innermost
            in_specs=in_specs,
            out_specs=pl.BlockSpec((tm, 1), lambda i, j: (i, 0)),
            scratch_shapes=[
                pltpu.VMEM((tm, Hp), bf16),         # resident hidden activations
                pltpu.VMEM((tm, 1), f32),           # running max
                pltpu.VMEM((tm, 1), f32),           # running sum(exp)
                pltpu.VMEM((tm, 1), f32),           # running sum(t * logit)
            ]),
        compiler_params=pltpu.CompilerParams(
            dimension_semantics=("parallel", "arbitrary"),
            vmem_limit_bytes=int(vmem_limit)),
    )(y, z, t, inv_den, *flat)

    # Tiny final reduction (padded batch rows are exactly 0 and sliced away).
    return jnp.sum(row_loss[:B, 0]) / B


def init_params(key, in_size, hidden_size, vocab_size, mlp_layer):
    """Deterministic synthetic weights for get_mlp(in, hidden, vocab, mlp_layer, dropout)."""
    params = []
    cur = in_size
    for _ in range(mlp_layer):
        key, k1, k2 = jax.random.split(key, 3)
        w = jax.random.normal(k1, (cur, hidden_size), jnp.float32) * 0.1
        b = jax.random.normal(k2, (hidden_size,), jnp.float32) * 0.1
        params.append((w, b))
        cur = hidden_size
    key, k1, k2 = jax.random.split(key, 3)
    w = jax.random.normal(k1, (cur, vocab_size), jnp.float32) * 0.1
    b = jax.random.normal(k2, (vocab_size,), jnp.float32) * 0.1
    params.append((w, b))
    return params


if __name__ == "__main__":
    # Small shapes that still exercise batch padding, hidden padding, multiple vocab
    # tiles at the default tv=1024 (online softmax), and a partially padded last tile.
    B, ysize, zsize = 10, 16, 16
    hidden, vocab, mlp_layer = 96, 2500, 2

    key = jax.random.PRNGKey(0)
    k1, k2, k3, kp = jax.random.split(key, 4)
    yvecs = jax.random.normal(k1, (B, ysize), jnp.float32)
    zvecs = jax.random.normal(k2, (B, zsize), jnp.float32)
    tgts = jax.random.randint(k3, (B, vocab), 0, 4).astype(jnp.float32)
    tgts = tgts.at[:, 0].add(1.0)                     # guarantee tgts.sum(1) > 0
    tgts_mask = jnp.ones((B, vocab), jnp.float32)     # unused by the forward

    params = init_params(kp, ysize + zsize, hidden, vocab, mlp_layer)

    loss = bag_of_words_loss(yvecs, zvecs, tgts, tgts_mask, params)
    loss = jax.block_until_ready(loss)

    # Pure-JAX f32 reference.
    x = jnp.concatenate([yvecs, zvecs], -1)
    h = x
    for (w, b) in params[:-1]:
        h = jnp.maximum(h @ w + b, 0.0)
    logits = h @ params[-1][0] + params[-1][1]
    logp = jax.nn.log_softmax(logits, -1)
    ref = -jnp.mean(jnp.sum(logp * tgts, 1) / jnp.sum(tgts, 1))

    # bf16 matmuls => relaxed tolerance vs the f32 reference.
    assert np.allclose(np.asarray(loss), np.asarray(ref), rtol=2e-2, atol=2e-2), (loss, ref)
    print("KERNEL_OK")
</pallas_src>

<mosaic_0001>
module attributes {stable_mosaic.version = 11 : i64} {
  func.func @kernel(%arg0: i32, %arg1: i32, %arg2: memref<32x16xbf16, #tpu.memory_space<vmem>>, %arg3: memref<32x16xbf16, #tpu.memory_space<vmem>>, %arg4: memref<32x1024xi8, #tpu.memory_space<vmem>>, %arg5: memref<32x1xf32, #tpu.memory_space<vmem>>, %arg6: memref<16x128xbf16, #tpu.memory_space<vmem>>, %arg7: memref<16x128xbf16, #tpu.memory_space<vmem>>, %arg8: memref<1x128xf32, #tpu.memory_space<vmem>>, %arg9: memref<128x128xbf16, #tpu.memory_space<vmem>>, %arg10: memref<1x128xf32, #tpu.memory_space<vmem>>, %arg11: memref<1x128x1024xbf16, #tpu.memory_space<vmem>>, %arg12: memref<1x1024xf32, #tpu.memory_space<vmem>>, %arg13: memref<32x1xf32, #tpu.memory_space<vmem>>, %arg14: memref<32x128xbf16, #tpu.memory_space<vmem>>, %arg15: memref<32x1xf32, #tpu.memory_space<vmem>>, %arg16: memref<32x1xf32, #tpu.memory_space<vmem>>, %arg17: memref<32x1xf32, #tpu.memory_space<vmem>>) attributes {dimension_semantics = [#tpu.dimension_semantics<parallel>, #tpu.dimension_semantics<arbitrary>], iteration_bounds = array<i64: 1, 3>, scalar_prefetch = 0 : i64, scratch_operands = 4 : i64, tpu.core_type = #tpu.core_type<tc>, window_params = [{transform_indices = @transform_0, window_bounds = array<i64: 32, 16>}, {transform_indices = @transform_1, window_bounds = array<i64: 32, 16>}, {transform_indices = @transform_2, window_bounds = array<i64: 32, 1024>}, {transform_indices = @transform_3, window_bounds = array<i64: 32, 1>}, {pipeline_mode = #tpu.pipeline_mode<synchronous>, transform_indices = @transform_4, window_bounds = array<i64: 16, 128>}, {pipeline_mode = #tpu.pipeline_mode<synchronous>, transform_indices = @transform_5, window_bounds = array<i64: 16, 128>}, {pipeline_mode = #tpu.pipeline_mode<synchronous>, transform_indices = @transform_6, window_bounds = array<i64: 1, 128>}, {pipeline_mode = #tpu.pipeline_mode<synchronous>, transform_indices = @transform_7, window_bounds = array<i64: 128, 128>}, {pipeline_mode = #tpu.pipeline_mode<synchronous>, transform_indices = @transform_8, window_bounds = array<i64: 1, 128>}, {transform_indices = @transform_9, window_bounds = array<i64: 1, 128, 1024>}, {transform_indices = @transform_10, window_bounds = array<i64: 1, 1024>}, {transform_indices = @transform_11, window_bounds = array<i64: 32, 1>}]} {
    %c0_i32 = arith.constant 0 : i32
    %0 = arith.cmpi eq, %arg1, %c0_i32 : i32
    %1 = arith.extui %0 : i1 to i32
    %c0_i32_0 = arith.constant 0 : i32
    %2 = arith.cmpi ne, %1, %c0_i32_0 : i32
    scf.if %2 {
      %c0_25 = arith.constant 0 : index
      %c0_26 = arith.constant 0 : index
      %37 = vector.load %arg2[%c0_25, %c0_26] : memref<32x16xbf16, #tpu.memory_space<vmem>>, vector<32x16xbf16>
      %c0_27 = arith.constant 0 : index
      %c0_28 = arith.constant 0 : index
      %38 = vector.load %arg6[%c0_27, %c0_28] : memref<16x128xbf16, #tpu.memory_space<vmem>>, vector<16x128xbf16>
      %cst_29 = arith.constant dense<0.000000e+00> : vector<32x128xf32>
      %39 = tpu.matmul %37, %38, %cst_29 {dimension_numbers = #tpu.dot_dimension_numbers<[1], [0], [0], [1], [0, 0, 1, 1], [], []>} : vector<32x16xbf16>, vector<16x128xbf16>, vector<32x128xf32> -> vector<32x128xf32>
      %c0_30 = arith.constant 0 : index
      %c0_31 = arith.constant 0 : index
      %40 = vector.load %arg3[%c0_30, %c0_31] : memref<32x16xbf16, #tpu.memory_space<vmem>>, vector<32x16xbf16>
      %c0_32 = arith.constant 0 : index
      %c0_33 = arith.constant 0 : index
      %41 = vector.load %arg7[%c0_32, %c0_33] : memref<16x128xbf16, #tpu.memory_space<vmem>>, vector<16x128xbf16>
      %cst_34 = arith.constant dense<0.000000e+00> : vector<32x128xf32>
      %42 = tpu.matmul %40, %41, %cst_34 {dimension_numbers = #tpu.dot_dimension_numbers<[1], [0], [0], [1], [0, 0, 1, 1], [], []>} : vector<32x16xbf16>, vector<16x128xbf16>, vector<32x128xf32> -> vector<32x128xf32>
      %43 = arith.addf %39, %42 : vector<32x128xf32>
      %c0_35 = arith.constant 0 : index
      %c0_36 = arith.constant 0 : index
      %44 = vector.load %arg8[%c0_35, %c0_36] : memref<1x128xf32, #tpu.memory_space<vmem>>, vector<1x128xf32>
      %45 = vector.broadcast %44 : vector<1x128xf32> to vector<32x128xf32>
      %46 = arith.addf %43, %45 : vector<32x128xf32>
      %cst_37 = arith.constant 0.000000e+00 : f32
      %47 = vector.broadcast %cst_37 : f32 to vector<32x128xf32>
      %48 = arith.maximumf %46, %47 : vector<32x128xf32>
      %c0_38 = arith.constant 0 : index
      %c0_39 = arith.constant 0 : index
      %49 = vector.load %arg9[%c0_38, %c0_39] : memref<128x128xbf16, #tpu.memory_space<vmem>>, vector<128x128xbf16>
      %c0_40 = arith.constant 0 : index
      %c0_41 = arith.constant 0 : index
      %50 = vector.load %arg10[%c0_40, %c0_41] : memref<1x128xf32, #tpu.memory_space<vmem>>, vector<1x128xf32>
      %51 = arith.truncf %48 : vector<32x128xf32> to vector<32x128xbf16>
      %cst_42 = arith.constant dense<0.000000e+00> : vector<32x128xf32>
      %52 = tpu.matmul %51, %49, %cst_42 {dimension_numbers = #tpu.dot_dimension_numbers<[1], [0], [0], [1], [0, 0, 1, 1], [], []>} : vector<32x128xbf16>, vector<128x128xbf16>, vector<32x128xf32> -> vector<32x128xf32>
      %53 = vector.broadcast %50 : vector<1x128xf32> to vector<32x128xf32>
      %54 = arith.addf %52, %53 : vector<32x128xf32>
      %cst_43 = arith.constant 0.000000e+00 : f32
      %55 = vector.broadcast %cst_43 : f32 to vector<32x128xf32>
      %56 = arith.maximumf %54, %55 : vector<32x128xf32>
      %57 = arith.truncf %56 : vector<32x128xf32> to vector<32x128xbf16>
      %c0_44 = arith.constant 0 : index
      %c0_45 = arith.constant 0 : index
      %58 = vector.load %arg14[%c0_44, %c0_45] : memref<32x128xbf16, #tpu.memory_space<vmem>>, vector<32x128xbf16>
      tpu.vector_store %arg14[%c0_44, %c0_45], %57 {strides = array<i32>} : memref<32x128xbf16, #tpu.memory_space<vmem>>, vector<32x128xbf16>,
      %cst_46 = arith.constant 0xFF800000 : f32
      %59 = vector.broadcast %cst_46 : f32 to vector<32x1xf32>
      %c0_47 = arith.constant 0 : index
      %c0_48 = arith.constant 0 : index
      %60 = vector.load %arg15[%c0_47, %c0_48] : memref<32x1xf32, #tpu.memory_space<vmem>>, vector<32x1xf32>
      tpu.vector_store %arg15[%c0_47, %c0_48], %59 {strides = array<i32>} : memref<32x1xf32, #tpu.memory_space<vmem>>, vector<32x1xf32>,
      %cst_49 = arith.constant 0.000000e+00 : f32
      %61 = vector.broadcast %cst_49 : f32 to vector<32x1xf32>
      %c0_50 = arith.constant 0 : index
      %c0_51 = arith.constant 0 : index
      %62 = vector.load %arg16[%c0_50, %c0_51] : memref<32x1xf32, #tpu.memory_space<vmem>>, vector<32x1xf32>
      tpu.vector_store %arg16[%c0_50, %c0_51], %61 {strides = array<i32>} : memref<32x1xf32, #tpu.memory_space<vmem>>, vector<32x1xf32>,
      %cst_52 = arith.constant 0.000000e+00 : f32
      %63 = vector.broadcast %cst_52 : f32 to vector<32x1xf32>
      %c0_53 = arith.constant 0 : index
      %c0_54 = arith.constant 0 : index
      %64 = vector.load %arg17[%c0_53, %c0_54] : memref<32x1xf32, #tpu.memory_space<vmem>>, vector<32x1xf32>
      tpu.vector_store %arg17[%c0_53, %c0_54], %63 {strides = array<i32>} : memref<32x1xf32, #tpu.memory_space<vmem>>, vector<32x1xf32>,
    } else {
    }
    %c0 = arith.constant 0 : index
    %c0_1 = arith.constant 0 : index
    %c0_2 = arith.constant 0 : index
    %3 = vector.load %arg11[%c0, %c0_1, %c0_2] : memref<1x128x1024xbf16, #tpu.memory_space<vmem>>, vector<1x128x1024xbf16>
    %4 = vector.shape_cast %3 : vector<1x128x1024xbf16> to vector<128x1024xbf16>
    %c0_3 = arith.constant 0 : index
    %c0_4 = arith.constant 0 : index
    %5 = vector.load %arg12[%c0_3, %c0_4] : memref<1x1024xf32, #tpu.memory_space<vmem>>, vector<1x1024xf32>
    %c0_5 = arith.constant 0 : index
    %c0_6 = arith.constant 0 : index
    %6 = vector.load %arg14[%c0_5, %c0_6] : memref<32x128xbf16, #tpu.memory_space<vmem>>, vector<32x128xbf16>
    %cst = arith.constant dense<0.000000e+00> : vector<32x1024xf32>
    %7 = tpu.matmul %6, %4, %cst {dimension_numbers = #tpu.dot_dimension_numbers<[1], [0], [0], [1], [0, 0, 1, 1], [], []>} : vector<32x128xbf16>, vector<128x1024xbf16>, vector<32x1024xf32> -> vector<32x1024xf32>
    %8 = vector.broadcast %5 : vector<1x1024xf32> to vector<32x1024xf32>
    %9 = arith.addf %7, %8 : vector<32x1024xf32>
    %c0_7 = arith.constant 0 : index
    %c0_8 = arith.constant 0 : index
    %10 = vector.load %arg4[%c0_7, %c0_8] : memref<32x1024xi8, #tpu.memory_space<vmem>>, vector<32x1024xi8>
    %11 = arith.sitofp %10 : vector<32x1024xi8> to vector<32x1024xf32>
    %c0_9 = arith.constant 0 : index
    %c0_10 = arith.constant 0 : index
    %12 = vector.load %arg15[%c0_9, %c0_10] : memref<32x1xf32, #tpu.memory_space<vmem>>, vector<32x1xf32>
    %cst_11 = arith.constant dense<0xFF800000> : vector<32xf32>
    %13 = vector.multi_reduction <maximumf>, %9, %cst_11 [1] : vector<32x1024xf32> to vector<32xf32>
    %14 = vector.shape_cast %13 : vector<32xf32> to vector<32x1xf32>
    %15 = arith.maximumf %12, %14 : vector<32x1xf32>
    %16 = arith.subf %12, %15 : vector<32x1xf32>
    %17 = math.exp %16 : vector<32x1xf32>
    %c0_12 = arith.constant 0 : index
    %c0_13 = arith.constant 0 : index
    %18 = vector.load %arg16[%c0_12, %c0_13] : memref<32x1xf32, #tpu.memory_space<vmem>>, vector<32x1xf32>
    %19 = arith.mulf %17, %18 : vector<32x1xf32>
    %20 = vector.broadcast %15 : vector<32x1xf32> to vector<32x1024xf32>
    %21 = arith.subf %9, %20 : vector<32x1024xf32>
    %22 = math.exp %21 : vector<32x1024xf32>
    %cst_14 = arith.constant dense<0.000000e+00> : vector<32xf32>
    %23 = vector.multi_reduction <add>, %22, %cst_14 [1] : vector<32x1024xf32> to vector<32xf32>
    %24 = vector.shape_cast %23 : vector<32xf32> to vector<32x1xf32>
    %25 = arith.addf %19, %24 : vector<32x1xf32>
    %c0_15 = arith.constant 0 : index
    %c0_16 = arith.constant 0 : index
    %26 = vector.load %arg16[%c0_15, %c0_16] : memref<32x1xf32, #tpu.memory_space<vmem>>, vector<32x1xf32>
    tpu.vector_store %arg16[%c0_15, %c0_16], %25 {strides = array<i32>} : memref<32x1xf32, #tpu.memory_space<vmem>>, vector<32x1xf32>,
    %c0_17 = arith.constant 0 : index
    %c0_18 = arith.constant 0 : index
    %27 = vector.load %arg15[%c0_17, %c0_18] : memref<32x1xf32, #tpu.memory_space<vmem>>, vector<32x1xf32>
    tpu.vector_store %arg15[%c0_17, %c0_18], %15 {strides = array<i32>} : memref<32x1xf32, #tpu.memory_space<vmem>>, vector<32x1xf32>,
    %c0_19 = arith.constant 0 : index
    %c0_20 = arith.constant 0 : index
    %28 = vector.load %arg17[%c0_19, %c0_20] : memref<32x1xf32, #tpu.memory_space<vmem>>, vector<32x1xf32>
    %29 = arith.mulf %11, %9 : vector<32x1024xf32>
    %cst_21 = arith.constant dense<0.000000e+00> : vector<32xf32>
    %30 = vector.multi_reduction <add>, %29, %cst_21 [1] : vector<32x1024xf32> to vector<32xf32>
    %31 = vector.shape_cast %30 : vector<32xf32> to vector<32x1xf32>
    %32 = arith.addf %28, %31 : vector<32x1xf32>
    %c0_22 = arith.constant 0 : index
    %c0_23 = arith.constant 0 : index
    %33 = vector.load %arg17[%c0_22, %c0_23] : memref<32x1xf32, #tpu.memory_space<vmem>>, vector<32x1xf32>
    tpu.vector_store %arg17[%c0_22, %c0_23], %32 {strides = array<i32>} : memref<32x1xf32, #tpu.memory_space<vmem>>, vector<32x1xf32>,
    %c2_i32 = arith.constant 2 : i32
    %34 = arith.cmpi eq, %arg1, %c2_i32 : i32
    %35 = arith.extui %34 : i1 to i32
    %c0_i32_24 = arith.constant 0 : i32
    %36 = arith.cmpi ne, %35, %c0_i32_24 : i32
    scf.if %36 {
      %c0_25 = arith.constant 0 : index
      %c0_26 = arith.constant 0 : index
      %37 = vector.load %arg15[%c0_25, %c0_26] : memref<32x1xf32, #tpu.memory_space<vmem>>, vector<32x1xf32>
      %c0_27 = arith.constant 0 : index
      %c0_28 = arith.constant 0 : index
      %38 = vector.load %arg16[%c0_27, %c0_28] : memref<32x1xf32, #tpu.memory_space<vmem>>, vector<32x1xf32>
      %39 = math.log %38 : vector<32x1xf32>
      %40 = arith.addf %37, %39 : vector<32x1xf32>
      %c0_29 = arith.constant 0 : index
      %c0_30 = arith.constant 0 : index
      %41 = vector.load %arg5[%c0_29, %c0_30] : memref<32x1xf32, #tpu.memory_space<vmem>>, vector<32x1xf32>
      %c0_31 = arith.constant 0 : index
      %c0_32 = arith.constant 0 : index
      %42 = vector.load %arg17[%c0_31, %c0_32] : memref<32x1xf32, #tpu.memory_space<vmem>>, vector<32x1xf32>
      %43 = arith.mulf %42, %41 : vector<32x1xf32>
      %44 = arith.subf %40, %43 : vector<32x1xf32>
      %cst_33 = arith.constant 0.000000e+00 : f32
      %45 = vector.broadcast %cst_33 : f32 to vector<32x1xf32>
      %46 = arith.cmpf one, %41, %45 : vector<32x1xf32>
      %cst_34 = arith.constant 0.000000e+00 : f32
      %47 = vector.broadcast %cst_34 : f32 to vector<32x1xf32>
      %48 = arith.select %46, %44, %47 : vector<32x1xi1>, vector<32x1xf32>
      %c0_35 = arith.constant 0 : index
      %c0_36 = arith.constant 0 : index
      %49 = vector.load %arg13[%c0_35, %c0_36] : memref<32x1xf32, #tpu.memory_space<vmem>>, vector<32x1xf32>
      tpu.vector_store %arg13[%c0_35, %c0_36], %48 {strides = array<i32>} : memref<32x1xf32, #tpu.memory_space<vmem>>, vector<32x1xf32>,
    } else {
    }
    return
  }
  func.func @transform_0(%arg0: i32, %arg1: i32) -> (i32, i32) {
    %c0_i32 = arith.constant 0 : i32
    %c0_i32_0 = arith.constant 0 : i32
    return %arg0, %c0_i32 : i32, i32
  }
  func.func @transform_1(%arg0: i32, %arg1: i32) -> (i32, i32) {
    %c0_i32 = arith.constant 0 : i32
    %c0_i32_0 = arith.constant 0 : i32
    return %arg0, %c0_i32 : i32, i32
  }
  func.func @transform_2(%arg0: i32, %arg1: i32) -> (i32, i32) {
    %c0_i32 = arith.constant 0 : i32
    return %arg0, %arg1 : i32, i32
  }
  func.func @transform_3(%arg0: i32, %arg1: i32) -> (i32, i32) {
    %c0_i32 = arith.constant 0 : i32
    %c0_i32_0 = arith.constant 0 : i32
    return %arg0, %c0_i32 : i32, i32
  }
  func.func @transform_4(%arg0: i32, %arg1: i32) -> (i32, i32) {
    %c0_i32 = arith.constant 0 : i32
    %c0_i32_0 = arith.constant 0 : i32
    %c0_i32_1 = arith.constant 0 : i32
    return %c0_i32, %c0_i32_0 : i32, i32
  }
  func.func @transform_5(%arg0: i32, %arg1: i32) -> (i32, i32) {
    %c0_i32 = arith.constant 0 : i32
    %c0_i32_0 = arith.constant 0 : i32
    %c0_i32_1 = arith.constant 0 : i32
    return %c0_i32, %c0_i32_0 : i32, i32
  }
  func.func @transform_6(%arg0: i32, %arg1: i32) -> (i32, i32) {
    %c0_i32 = arith.constant 0 : i32
    %c0_i32_0 = arith.constant 0 : i32
    %c0_i32_1 = arith.constant 0 : i32
    return %c0_i32, %c0_i32_0 : i32, i32
  }
  func.func @transform_7(%arg0: i32, %arg1: i32) -> (i32, i32) {
    %c0_i32 = arith.constant 0 : i32
    %c0_i32_0 = arith.constant 0 : i32
    %c0_i32_1 = arith.constant 0 : i32
    return %c0_i32, %c0_i32_0 : i32, i32
  }
  func.func @transform_8(%arg0: i32, %arg1: i32) -> (i32, i32) {
    %c0_i32 = arith.constant 0 : i32
    %c0_i32_0 = arith.constant 0 : i32
    %c0_i32_1 = arith.constant 0 : i32
    return %c0_i32, %c0_i32_0 : i32, i32
  }
  func.func @transform_9(%arg0: i32, %arg1: i32) -> (i32, i32, i32) {
    %c0_i32 = arith.constant 0 : i32
    %c0_i32_0 = arith.constant 0 : i32
    %c0_i32_1 = arith.constant 0 : i32
    return %arg1, %c0_i32, %c0_i32_0 : i32, i32, i32
  }
  func.func @transform_10(%arg0: i32, %arg1: i32) -> (i32, i32) {
    %c0_i32 = arith.constant 0 : i32
    %c0_i32_0 = arith.constant 0 : i32
    return %c0_i32, %arg1 : i32, i32
  }
  func.func @transform_11(%arg0: i32, %arg1: i32) -> (i32, i32) {
    %c0_i32 = arith.constant 0 : i32
    %c0_i32_0 = arith.constant 0 : i32
    return %arg0, %c0_i32 : i32, i32
  }
}

</mosaic_0001>

<bundles_post_ra>
// kernel: tpu_custom_call.1
= control target key start
LH: loop header
LB: loop body
LE: loop exit
PB: predicated region body
PF: predicated region fallthrough
CT: control target
= control target key end

     0   :  { %s4063_s0 = inlined_call_operand.hbm [shape: bf16[32,16], index: 0, kind: input, shape index: {}]   ;;  %s4064_s1 = inlined_call_operand.hbm [shape: bf16[32,16], index: 1, kind: input, shape index: {}]   ;;  %s4065_s2 = inlined_call_operand.hbm [shape: s8[32,3072], index: 2, kind: input, shape index: {}]   ;;  %s4066_s3 = inlined_call_operand.hbm [shape: f32[32,1], index: 3, kind: input, shape index: {}]   ;;  %s4067_s4 = inlined_call_operand.hbm [shape: bf16[16,128], index: 4, kind: input, shape index: {}]   ;;  %s4068_s5 = inlined_call_operand.hbm [shape: bf16[16,128], index: 5, kind: input, shape index: {}]   ;;  %s4069_s6 = inlined_call_operand.hbm [shape: f32[1,128], index: 6, kind: input, shape index: {}]   ;;  %s4070_s7 = inlined_call_operand.hbm [shape: bf16[128,128], index: 7, kind: input, shape index: {}]   ;;  %s4071_s8 = inlined_call_operand.hbm [shape: f32[1,128], index: 8, kind: input, shape index: {}]   ;;  %s4072_s9 = inlined_call_operand.hbm [shape: bf16[3,128,1024], index: 9, kind: input, shape index: {}]   ;;  %s4073_s10 = inlined_call_operand.hbm [shape: f32[1,3072], index: 10, kind: input, shape index: {}]   ;;  %s4074_s11 = inlined_call_operand.hbm [shape: f32[32,1], index: 11, kind: output, shape index: {}]  }
   0x1   :  { %4110 = sst [smem:[#allocation48_spill]] %s4063_s0 }
   0x2   :  { %4111 = sst [smem:[#allocation49_spill]] %s4064_s1 }
   0x3   :  { %4112 = sst [smem:[#allocation50_spill]] %s4065_s2 }
   0x4   :  { %4113 = sst [smem:[#allocation51_spill]] %s4067_s4 }
   0x5   :  { %4114 = sst [smem:[#allocation52_spill]] %s4073_s10 }
   0x6   :  { %4115 = sst [smem:[#allocation53_spill]] %s4074_s11 }
   0x7   :  { %16 = vsyncpa [#allocation7], 0 }
   0x8   :  { %17 = vsyncpa [#allocation10], 0 }
   0x9   :  { %18 = vsyncpa [#allocation14], 0 }
   0xa   :  { %19 = vsyncpa [#allocation17], 0 }
   0xb   :  { %20 = vsyncpa [#allocation20], 0 }
   0xc   :  { %21 = vsyncpa [#allocation8], 0  ;;  %s3157_s17 = smov 0   ;;  %s3159_s18 = smov 0  }
   0xd   :  { %s3161_s19 = smov 0   ;;  %s3163_s20 = smov 0  }
   0xe   :  { %s3165_s21 = smov 0   ;;  %s3167_s22 = smov 0  }
   0xf LB: > { %4116 = sst [smem:[#allocation33_spill]] %s3056_s18  ;;  %s3188_s23 = sadd.s32 4294967295, %s3072_s22   ;;  %s3072_s22 = sphi %s3167_s22, %s27_s22   ;;  %s3068_s21 = sphi %s3165_s21, %s4192_s21   ;;  %s3064_s20 = sphi %s3163_s20, %s4191_s20   ;;  %s3060_s19 = sphi %s3161_s19, %s4189_s19   ;;  %s3056_s18 = sphi %s3159_s18, %s4188_s18   ;;  %s3052_s17 = sphi %s3157_s17, %s4187_s17  }
  0x10   : > { %4117 = sst [smem:[#allocation34_spill]] %s3060_s19  ;;  %p2214_p0 = scmp.ge.s32.totalorder %s3072_s22, 1 }
  0x11   : > { %4118 = sst [smem:[#allocation35_spill]] %s3064_s20  ;;  %p4075_p1 = scmp.eq.s32.totalorder %s3188_s23, 0 }
  0x12   : > { %4119 = sst [smem:[#allocation36_spill]] %s3072_s22  ;;  %p333_p2 = scmp.lt.s32.totalorder %s3072_s22, 4 }
  0x13   : > { %4120 = sst [smem:[#allocation37_spill]] %s3188_s23  ;;  %s3074_s25 = smov [#allocation6]  }
  0x14   : > { %p3193_p3 = pnand %p2214_p0, %p333_p2  ;;  %s348_s26 = sshll.u32 %s3074_s25, 4  ;;  %s349_s26 = int_to_ptr.vmem [resolvable:$true] %s348_s26 }
  0x15   : > { %s4124_s0 = sld [smem:[#allocation48_spill]] }
  0x16   : > { %s4121_s24 = scalar_select %p3193_p3, 1, 0 }
  0x17   : > { %p2432_p4 = pneg %p3193_p3 }
  0x18   : > { %4122 = sst [smem:[#allocation38_spill]] %s4121_s24 }
  0x19   : > { %p3201_p5 = pnand %p2432_p4, %p4075_p1 }
  0x1b   : > { %s4123_s27 = scalar_select %p3201_p5, 1, 0 }
  0x1c   : > { %s2650_s30 = scalar_lea.hbm %s4124_s0, 256  ;;  %p3213_p7 = pneg %p3201_p5 }
  0x1d   : > { %p2651_p6 = scmp.ne.s32.totalorder %s4124_s0, %s2650_s30  ;;  %p2657_p10 = scmp.lt.u32.totalorder %s2650_s30, %s4124_s0 }
  0x1e   : > { %s4125_s14 = scalar_select %p3213_p7, 1, 0 }
  0x1f   : > { %p2653_p8 = pnand %p3213_p7, %p2651_p6 }
  0x21   : > { %p2654_p9 = pneg %p2653_p8 }
  0x23   : > { %p2659_p11 = pnand %p2657_p10, %p2654_p9 }
  0x25   : > { %2662 = shalt.err (!%p2659_p11)
}
  0x26   : > { %s2663_s25 = scalar_lea.vmem %s349_s26, 256  ;;  %p2671_p2 = scmp.lt.s32.totalorder %s349_s26, %s349_s26 }
  0x27   : > { %p2664_p12 = scmp.ne.s32.totalorder %s349_s26, %s2663_s25  ;;  %p2672_p4 = scmp.lt.s32.totalorder %s2663_s25, %s2663_s25 }
  0x29   : > { %p2666_p13 = pnand %p2664_p12, %p3213_p7  ;;  %p2673_p1 = por %p2672_p4, %p2671_p2 }
  0x2b   : > { %p2667_p0 = pneg %p2666_p13 }
  0x2d   : > { %p2674_p3 = pnand %p2673_p1, %p2667_p0 }
  0x2f   : > { %2677 = shalt.err (!%p2674_p3)
}
  0x30   : > { %s4077_s28 = smov 64   ;;  %s4079_s29 = smov 4  }
  0x31   : > { %2435 = dma.hbm_to_vmem [thread:$0]  (!%p3201_p5), %s4124_s0, 256, %s349_s26, [#allocation7], %s4077_s28, %s4077_s28, %s4079_s29  }
  0x32   : > { %s36_s13 = sadd.s32 1, %s3068_s21  ;;  %s100_s15 = sadd.s32 1, %s3060_s19 }
  0x33   : > { %p37_p1 = scmp.ge.s32.totalorder %s36_s13, 3  ;;  %p107_p3 = scmp.ne.s32.totalorder %s3060_s19, %s3056_s18 }
  0x34   : > { %p108_p6 = scmp.eq.s32.totalorder %s3072_s22, 0  ;;  %p113_p9 = scmp.ne.s32.totalorder %s3056_s18, %s3052_s17 }
  0x35   : > { %s4194_s13 = smov (%p37_p1, %s36_s13), 0  ;;  %p2475_p10 = scmp.lt.s32.totalorder %s3072_s22, 3 }
  0x36   : > { %4126 = sst [smem:[#allocation39_spill]] %s4194_s13  ;;  %p3239_p8 = por %p108_p6, %p107_p3 }
  0x37   : > { %s96_s25 = ssub.s32 %s3068_s21, %s4194_s13  ;;  %p4128_p12 = scmp.eq.s32.totalorder %s3188_s23, 0 }
  0x38   : > { %p98_p11 = scmp.eq.s32.totalorder %s96_s25, 0  ;;  %s455_s30 = sand.u32 1, %s3072_s22  }
  0x39   : > { %p3250_p13 = por %p4128_p12, %p113_p9  ;;  %s3256_s12 = sand.u32 1, %s3060_s19  }
  0x3a   : > { %s3259_s28 = scalar_select %p98_p11, %s3060_s19, %s100_s15  }
  0x3b   : > { %s4129_s26 = scalar_select %p3250_p13, 1, 0 }
  0x3c   : > { %4131 = sst [smem:[#allocation41_spill]] %s3259_s28  ;;  %s2224_s29 = sshll.u32 %s3256_s12, 6 }
  0x3d   : > { %4130 = sst [smem:[#allocation40_spill]] %s4129_s26  ;;  %s2335_s0 = sshll.u32 %s3068_s21, 10 }
  0x3e   : > { %s4132_s2 = sld [smem:[#allocation50_spill]]  ;;  %s459_s25 = scalar_lea.vmem [#allocation11], %s2224_s29 }
  0x3f   : > { %s469_s13 = sshll.u32 %s459_s25, 4  ;;  %p3272_p0 = pnand %p2475_p10, %p3239_p8  ;;  %s3268_s13 = int_to_ptr.vmem [resolvable:$true] %s469_s13 }
  0x40   : > { %s2227_s15 = sshll.u32 %s3256_s12, 9  ;;  %s3277_s28 = scalar_lea.sflag [#allocation7], %s455_s30 }
  0x41   : > { %s4133_s22 = scalar_select %p3272_p0, 1, 0 }
  0x42   : > { %p3283_p4 = pneg %p3272_p0 }
  0x44   : > { %s3266_s17 = scalar_lea.hbm %s4132_s2, %s2335_s0  ;;  %s2683_s16 = scalar_lea.hbm %s4132_s2, 3072 }
  0x45   : > { %s2678_s11 = scalar_lea.hbm %s3266_s17, 1024  ;;  %p2684_p6 = scmp.lt.u32.totalorder %s3266_s17, %s4132_s2 }
  0x46   : > { %p2679_p2 = scmp.ne.s32.totalorder %s3266_s17, %s2678_s11  ;;  %p2685_p8 = scmp.lt.u32.totalorder %s2683_s16, %s2678_s11 }
  0x47   : > { %s4134_s0 = scalar_select %p3283_p4, 1, 0 }
  0x48   : > { %p2681_p1 = pnand %p3283_p4, %p2679_p2  ;;  %p2686_p9 = por %p2685_p8, %p2684_p6 }
  0x49   : > { %p2687_p10 = scmp.lt.u32.totalorder %s2678_s11, %s3266_s17 }
  0x4a   : > { %p2682_p3 = pneg %p2681_p1 }
  0x4b   : > { %p2688_p11 = por %p2687_p10, %p2686_p9 }
  0x4d   : > { %p2689_p12 = pnand %p2688_p11, %p2682_p3 }
  0x4f   : > { %2692 = shalt.err (!%p2689_p12)
}
  0x50   : > { %s2693_s30 = scalar_lea.vmem %s3268_s13, 1024  ;;  %s3077_s20 = smov [#allocation11]  }
  0x51   : > { %p2694_p2 = scmp.ne.s32.totalorder %s3268_s13, %s2693_s30  ;;  %s2698_s29 = sshll.u32 %s3077_s20, 4  ;;  %s2699_s29 = int_to_ptr.vmem [resolvable:$false] %s2698_s29 }
  0x52   : > { %s2700_s19 = scalar_lea.vmem %s2699_s29, 2048  ;;  %p2701_p5 = scmp.lt.s32.totalorder %s3268_s13, %s2699_s29 }
  0x53   : > { %p2696_p1 = pnand %p2694_p2, %p3283_p4  ;;  %p2702_p7 = scmp.lt.s32.totalorder %s2700_s19, %s2693_s30 }
  0x55   : > { %p2697_p13 = pneg %p2696_p1  ;;  %p2703_p6 = por %p2702_p7, %p2701_p5 }
  0x57   : > { %p2704_p8 = pnand %p2703_p6, %p2697_p13 }
  0x59   : > { %2707 = shalt.err (!%p2704_p8)
}
  0x5a   : > { %2460 = dma.hbm_to_vmem [thread:$0]  (!%p3272_p0), %s3266_s17, 1024, %s3268_s13, %s3277_s28  }
  0x5b   : > { %s3309_s11 = scalar_lea.vmem [#allocation21], %s2227_s15  ;;  %s3078_s25 = smov [#allocation9]  }
  0x5c   : > { %s364_s20 = sshll.u32 %s3078_s25, 4  ;;  %s4135_s1 = sld [smem:[#allocation49_spill]]  ;;  %s365_s20 = int_to_ptr.vmem [resolvable:$true] %s364_s20 }
  0x5d   : > { %p4136_p7 = scmp.ne.s32.totalorder %s4125_s14, 0 }
  0x62   : > { %s2708_s19 = scalar_lea.hbm %s4135_s1, 256 }
  0x63   : > { %p2709_p5 = scmp.ne.s32.totalorder %s4135_s1, %s2708_s19  ;;  %p2715_p9 = scmp.lt.u32.totalorder %s2708_s19, %s4135_s1 }
  0x65   : > { %p2711_p13 = pnand %p2709_p5, %p4136_p7 }
  0x67   : > { %p2712_p3 = pneg %p2711_p13 }
  0x69   : > { %p2717_p10 = pnand %p2715_p9, %p2712_p3 }
  0x6b   : > { %2720 = shalt.err (!%p2717_p10)
}
  0x6c   : > { %s2721_s15 = scalar_lea.vmem %s365_s20, 256  ;;  %p2729_p1 = scmp.lt.s32.totalorder %s365_s20, %s365_s20 }
  0x6d   : > { %p2722_p11 = scmp.ne.s32.totalorder %s365_s20, %s2721_s15  ;;  %p2730_p6 = scmp.lt.s32.totalorder %s2721_s15, %s2721_s15 }
  0x6f   : > { %p2724_p12 = pnand %p2722_p11, %p4136_p7  ;;  %p2731_p8 = por %p2730_p6, %p2729_p1 }
  0x71   : > { %p2725_p2 = pneg %p2724_p12 }
  0x73   : > { %p2732_p0 = pnand %p2731_p8, %p2725_p2 }
  0x75   : > { %2735 = shalt.err (!%p2732_p0)
}
  0x76   : > { %p4137_p5 = scmp.ne.s32.totalorder %s4123_s27, 0  ;;  %s4138_s2 = smov 4  }
  0x77   : > { %s4139_s26 = smov 64   ;;  %s3079_s29 = smov [#allocation13]  }
  0x78   : > { %2438 = dma.hbm_to_vmem [thread:$0]  (!%p4137_p5), %s4135_s1, 256, %s365_s20, [#allocation10], %s4139_s26, %s4139_s26, %s4138_s2  }
  0x79   : > { %s393_s19 = sshll.u32 %s3079_s29, 4  ;;  %s3080_s13 = smov [#allocation16]   ;;  %s394_s19 = int_to_ptr.vmem [resolvable:$true] %s393_s19 }
  0x7a   : > { %s420_s17 = sshll.u32 %s3080_s13, 4  ;;  %s4140_s4 = sld [smem:[#allocation51_spill]]  ;;  %s421_s17 = int_to_ptr.vmem [resolvable:$true] %s420_s17 }
  0x80   : > { %s2736_s18 = scalar_lea.hbm %s4140_s4, 128 }
  0x81   : > { %p2737_p0 = scmp.ne.s32.totalorder %s4140_s4, %s2736_s18  ;;  %p2743_p9 = scmp.lt.u32.totalorder %s2736_s18, %s4140_s4 }
  0x83   : > { %p2739_p13 = pnand %p2737_p0, %p4136_p7 }
  0x85   : > { %p2740_p3 = pneg %p2739_p13 }
  0x87   : > { %p2745_p10 = pnand %p2743_p9, %p2740_p3 }
  0x89   : > { %2748 = shalt.err (!%p2745_p10)
}
  0x8a   : > { %s2749_s20 = scalar_lea.vmem %s394_s19, 128  ;;  %p2757_p1 = scmp.lt.s32.totalorder %s394_s19, %s394_s19 }
  0x8b   : > { %p2750_p11 = scmp.ne.s32.totalorder %s394_s19, %s2749_s20  ;;  %p2758_p6 = scmp.lt.s32.totalorder %s2749_s20, %s2749_s20 }
  0x8d   : > { %p2752_p12 = pnand %p2750_p11, %p4136_p7  ;;  %p2759_p8 = por %p2758_p6, %p2757_p1 }
  0x8f   : > { %p2753_p2 = pneg %p2752_p12 }
  0x91   : > { %p2760_p4 = pnand %p2759_p8, %p2753_p2 }
  0x93   : > { %2763 = shalt.err (!%p2760_p4)
}
  0x94   : > { %2444 = dma.hbm_to_vmem [thread:$0]  (!%p4137_p5), %s4140_s4, 128, %s394_s19, [#allocation14], %s4139_s26, %s4139_s26, %s4138_s2  }
  0x95   : > { %s2336_s23 = sshll.u32 %s3068_s21, 13  ;;  %s2764_s30 = scalar_lea.hbm %s4069_s6, 16 }
  0x96   : > { %p2765_p4 = scmp.ne.s32.totalorder %s4069_s6, %s2764_s30  ;;  %p2771_p3 = scmp.lt.u32.totalorder %s2764_s30, %s4069_s6 }
  0x98   : > { %p2767_p0 = pnand %p2765_p4, %p4136_p7 }
  0x9a   : > { %p2768_p13 = pneg %p2767_p0 }
  0x9c   : > { %p2773_p9 = pnand %p2771_p3, %p2768_p13 }
  0x9e   : > { %2776 = shalt.err (!%p2773_p9)
}
  0x9f   : > { %s2777_s19 = scalar_lea.vmem %s421_s17, 16  ;;  %s2784_s20 = scalar_lea.vmem %s421_s17, 32 }
  0xa0   : > { %p2778_p10 = scmp.ne.s32.totalorder %s421_s17, %s2777_s19  ;;  %p2785_p2 = scmp.lt.s32.totalorder %s421_s17, %s421_s17 }
  0xa1   : > { %p2786_p1 = scmp.lt.s32.totalorder %s2784_s20, %s2777_s19 }
  0xa2   : > { %p2780_p11 = pnand %p2778_p10, %p4136_p7 }
  0xa3   : > { %p2787_p6 = por %p2786_p1, %p2785_p2 }
  0xa4   : > { %p2781_p12 = pneg %p2780_p11 }
  0xa6   : > { %p2788_p8 = pnand %p2787_p6, %p2781_p12 }
  0xa8   : > { %2791 = shalt.err (!%p2788_p8)
}
  0xa9   : > { %2450 = dma.hbm_to_vmem [thread:$0]  (!%p4137_p5), %s4069_s6, 16, %s421_s17, [#allocation17]  }
  0xaa   : > { %s3376_s30 = scalar_lea.hbm %s4072_s9, %s2336_s23  ;;  %s4141_s29 = sshll.u32 %s3309_s11, 4  ;;  %s3380_s29 = int_to_ptr.vmem [resolvable:$true] %s4141_s29 }
  0xab   : > { %s2792_s13 = scalar_lea.hbm %s3376_s30, 8192  ;;  %p4142_p0 = scmp.ne.s32.totalorder %s4134_s0, 0 }
  0xac   : > { %p2793_p4 = scmp.ne.s32.totalorder %s3376_s30, %s2792_s13  ;;  %s2797_s17 = scalar_lea.hbm %s4072_s9, 24576 }
  0xad   : > { %p2798_p9 = scmp.lt.u32.totalorder %s3376_s30, %s4072_s9  ;;  %p2799_p10 = scmp.lt.u32.totalorder %s2797_s17, %s2792_s13 }
  0xae   : > { %p2795_p13 = pnand %p2793_p4, %p4142_p0  ;;  %p2801_p12 = scmp.lt.u32.totalorder %s2792_s13, %s3376_s30 }
  0xaf   : > { %p2800_p11 = por %p2799_p10, %p2798_p9 }
  0xb0   : > { %p2796_p3 = pneg %p2795_p13 }
  0xb1   : > { %p2802_p2 = por %p2801_p12, %p2800_p11 }
  0xb3   : > { %p2803_p1 = pnand %p2802_p2, %p2796_p3 }
  0xb5   : > { %2806 = shalt.err (!%p2803_p1)
}
  0xb6   : > { %s2807_s11 = scalar_lea.vmem %s3380_s29, 8192  ;;  %s3081_s23 = smov [#allocation21]  }
  0xb7   : > { %p2808_p6 = scmp.ne.s32.totalorder %s3380_s29, %s2807_s11  ;;  %s2812_s10 = sshll.u32 %s3081_s23, 4  ;;  %s2813_s10 = int_to_ptr.vmem [resolvable:$false] %s2812_s10 }
  0xb8   : > { %s2814_s18 = scalar_lea.vmem %s2813_s10, 16384  ;;  %p2815_p13 = scmp.lt.s32.totalorder %s3380_s29, %s2813_s10 }
  0xb9   : > { %p2810_p8 = pnand %p2808_p6, %p4142_p0  ;;  %p2816_p5 = scmp.lt.s32.totalorder %s2814_s18, %s2807_s11 }
  0xbb   : > { %p2811_p4 = pneg %p2810_p8  ;;  %p2817_p9 = por %p2816_p5, %p2815_p13 }
  0xbd   : > { %p2818_p10 = pnand %p2817_p9, %p2811_p4 }
  0xbf   : > { %2821 = shalt.err (!%p2818_p10)
}
  0xc0   : > { %s3082_s24 = smov 512   ;;  %s3083_s16 = smov 32  }
  0xc1   : > { %p4143_p3 = scmp.ne.s32.totalorder %s4133_s22, 0  ;;  %s3084_s13 = smov [#allocation12]  }
  0xc2   : > { %s380_s15 = sshll.u32 %s3084_s13, 4  ;;  %s2822_s19 = scalar_lea.hbm %s4066_s3, 512  ;;  %s381_s15 = int_to_ptr.vmem [resolvable:$true] %s380_s15 }
  0xc3   : > { %2463 = dma.hbm_to_vmem [thread:$0]  (!%p4143_p3), %s3376_s30, 8192, %s3380_s29, %s3277_s28, %s3082_s24, %s3082_s24, %s3083_s16  }
  0xc4   : > { %p2823_p5 = scmp.ne.s32.totalorder %s4066_s3, %s2822_s19  ;;  %p2829_p2 = scmp.lt.u32.totalorder %s2822_s19, %s4066_s3 }
  0xc6   : > { %p2825_p11 = pnand %p2823_p5, %p4136_p7 }
  0xc8   : > { %p2826_p12 = pneg %p2825_p11 }
  0xca   : > { %p2831_p1 = pnand %p2829_p2, %p2826_p12 }
  0xcc   : > { %2834 = shalt.err (!%p2831_p1)
}
  0xcd   : > { %s2835_s30 = scalar_lea.vmem %s381_s15, 512  ;;  %p2843_p13 = scmp.lt.s32.totalorder %s381_s15, %s381_s15 }
  0xce   : > { %p2836_p6 = scmp.ne.s32.totalorder %s381_s15, %s2835_s30  ;;  %p2844_p9 = scmp.lt.s32.totalorder %s2835_s30, %s2835_s30 }
  0xd0   : > { %p2838_p8 = pnand %p2836_p6, %p4136_p7  ;;  %p2845_p10 = por %p2844_p9, %p2843_p13 }
  0xd2   : > { %p2839_p4 = pneg %p2838_p8 }
  0xd4   : > { %p2846_p3 = pnand %p2845_p10, %p2839_p4 }
  0xd6   : > { %2849 = shalt.err (!%p2846_p3)
}
  0xd7   : > { %s3085_s29 = smov 128   ;;  %s3086_s18 = smov 8  }
  0xd8   : > { %p4144_p5 = scmp.ne.s32.totalorder %s4123_s27, 0  ;;  %s3087_s13 = smov [#allocation15]  }
  0xd9   : > { %s406_s25 = sshll.u32 %s3087_s13, 4  ;;  %s3088_s17 = smov [#allocation18]   ;;  %s407_s25 = int_to_ptr.vmem [resolvable:$true] %s406_s25 }
  0xda   : > { %2441 = dma.hbm_to_vmem [thread:$0]  (!%p4144_p5), %s4066_s3, 512, %s381_s15, [#allocation10], %s3085_s29, %s3085_s29, %s3086_s18  }
  0xdb   : > { %s430_s19 = sshll.u32 %s3088_s17, 4  ;;  %s2850_s23 = scalar_lea.hbm %s4068_s5, 128  ;;  %s431_s19 = int_to_ptr.vmem [resolvable:$true] %s430_s19 }
  0xdc   : > { %p2851_p3 = scmp.ne.s32.totalorder %s4068_s5, %s2850_s23  ;;  %p2857_p2 = scmp.lt.u32.totalorder %s2850_s23, %s4068_s5 }
  0xde   : > { %p2853_p11 = pnand %p2851_p3, %p4136_p7 }
  0xe0   : > { %p2854_p12 = pneg %p2853_p11 }
  0xe2   : > { %p2859_p1 = pnand %p2857_p2, %p2854_p12 }
  0xe4   : > { %2862 = shalt.err (!%p2859_p1)
}
  0xe5   : > { %s2863_s15 = scalar_lea.vmem %s407_s25, 128  ;;  %p2871_p13 = scmp.lt.s32.totalorder %s407_s25, %s407_s25 }
  0xe6   : > { %p2864_p6 = scmp.ne.s32.totalorder %s407_s25, %s2863_s15  ;;  %p2872_p9 = scmp.lt.s32.totalorder %s2863_s15, %s2863_s15 }
  0xe8   : > { %p2866_p8 = pnand %p2864_p6, %p4136_p7  ;;  %p2873_p10 = por %p2872_p9, %p2871_p13 }
  0xea   : > { %p2867_p4 = pneg %p2866_p8 }
  0xec   : > { %p2874_p0 = pnand %p2873_p10, %p2867_p4 }
  0xee   : > { %2877 = shalt.err (!%p2874_p0)
}
  0xef   : > { %2447 = dma.hbm_to_vmem [thread:$0]  (!%p4144_p5), %s4068_s5, 128, %s407_s25, [#allocation14], %s4139_s26, %s4139_s26, %s4138_s2  }
  0xf0   : > { %s2878_s24 = scalar_lea.hbm %s4070_s7, 1024 }
  0xf1   : > { %p2879_p3 = scmp.ne.s32.totalorder %s4070_s7, %s2878_s24  ;;  %p2885_p12 = scmp.lt.u32.totalorder %s2878_s24, %s4070_s7 }
  0xf3   : > { %p2881_p0 = pnand %p2879_p3, %p4136_p7 }
  0xf5   : > { %p2882_p11 = pneg %p2881_p0 }
  0xf7   : > { %p2887_p2 = pnand %p2885_p12, %p2882_p11 }
  0xf9   : > { %2890 = shalt.err (!%p2887_p2)
}
  0xfa   : > { %s2891_s11 = scalar_lea.vmem %s431_s19, 1024  ;;  %p2899_p4 = scmp.lt.s32.totalorder %s431_s19, %s431_s19 }
  0xfb   : > { %p2892_p1 = scmp.ne.s32.totalorder %s431_s19, %s2891_s11  ;;  %p2900_p13 = scmp.lt.s32.totalorder %s2891_s11, %s2891_s11 }
  0xfd   : > { %p2894_p6 = pnand %p2892_p1, %p4136_p7  ;;  %p2901_p9 = por %p2900_p13, %p2899_p4 }
  0xff   : > { %p2895_p8 = pneg %p2894_p6 }
 0x101   : > { %p2902_p10 = pnand %p2901_p9, %p2895_p8 }
 0x103   : > { %2905 = shalt.err (!%p2902_p10)
}
 0x104   : > { %2453 = dma.hbm_to_vmem [thread:$0]  (!%p4144_p5), %s4070_s7, 1024, %s431_s19, [#allocation17], %s4139_s26, %s4139_s26, %s4138_s2  }
 0x105   : > { %s3089_s10 = smov [#allocation19]   ;;  %s2230_s15 = sshll.u32 %s3256_s12, 3 }
 0x106   : > { %s444_s30 = sshll.u32 %s3089_s10, 4  ;;  %s2906_s29 = scalar_lea.hbm %s4071_s8, 16  ;;  %s445_s30 = int_to_ptr.vmem [resolvable:$true] %s444_s30 }
 0x107   : > { %p2907_p3 = scmp.ne.s32.totalorder %s4071_s8, %s2906_s29  ;;  %p2913_p12 = scmp.lt.u32.totalorder %s2906_s29, %s4071_s8 }
 0x109   : > { %p2909_p0 = pnand %p2907_p3, %p4136_p7 }
 0x10b   : > { %p2910_p11 = pneg %p2909_p0 }
 0x10d   : > { %p2915_p2 = pnand %p2913_p12, %p2910_p11 }
 0x10f   : > { %2918 = shalt.err (!%p2915_p2)
}
 0x110   : > { %s2919_s2 = scalar_lea.vmem %s445_s30, 16  ;;  %s2926_s12 = scalar_lea.vmem %s445_s30, 32 }
 0x111   : > { %p2920_p1 = scmp.ne.s32.totalorder %s445_s30, %s2919_s2  ;;  %p2927_p4 = scmp.lt.s32.totalorder %s445_s30, %s445_s30 }
 0x112   : > { %p2928_p13 = scmp.lt.s32.totalorder %s2926_s12, %s2919_s2 }
 0x113   : > { %p2922_p6 = pnand %p2920_p1, %p4136_p7 }
 0x114   : > { %p2929_p9 = por %p2928_p13, %p2927_p4 }
 0x115   : > { %p2923_p8 = pneg %p2922_p6 }
 0x117   : > { %p2930_p10 = pnand %p2929_p9, %p2923_p8 }
 0x119   : > { %2933 = shalt.err (!%p2930_p10)
}
 0x11a   : > { %2456 = dma.hbm_to_vmem [thread:$0]  (!%p4144_p5), %s4071_s8, 16, %s445_s30, [#allocation20]  }
 0x11b   : > { %s2337_s17 = sshll.u32 %s3068_s21, 7  ;;  %s501_s20 = scalar_lea.vmem [#allocation22], %s2230_s15 }
 0x11c   : > { %s509_s11 = sshll.u32 %s501_s20, 4  ;;  %s4145_s23 = sld [smem:[#allocation52_spill]]  ;;  %s510_s11 = int_to_ptr.vmem [resolvable:$true] %s509_s11 }
 0x11d   : > { %p4146_p3 = scmp.ne.s32.totalorder %s4134_s0, 0 }
 0x122   : > { %s507_s10 = scalar_lea.hbm %s4145_s23, %s2337_s17  ;;  %s2939_s29 = scalar_lea.hbm %s4145_s23, 384 }
 0x123   : > { %s2934_s1 = scalar_lea.hbm %s507_s10, 128  ;;  %p2940_p5 = scmp.lt.u32.totalorder %s507_s10, %s4145_s23 }
 0x124   : > { %p2935_p7 = scmp.ne.s32.totalorder %s507_s10, %s2934_s1  ;;  %p2941_p12 = scmp.lt.u32.totalorder %s2939_s29, %s2934_s1 }
 0x125   : > { %p2943_p1 = scmp.lt.u32.totalorder %s2934_s1, %s507_s10 }
 0x126   : > { %p2937_p0 = pnand %p2935_p7, %p4146_p3  ;;  %p2942_p2 = por %p2941_p12, %p2940_p5 }
 0x128   : > { %p2938_p11 = pneg %p2937_p0  ;;  %p2944_p6 = por %p2943_p1, %p2942_p2 }
 0x12a   : > { %p2945_p8 = pnand %p2944_p6, %p2938_p11 }
 0x12c   : > { %2948 = shalt.err (!%p2945_p8)
}
 0x12d   : > { %s2949_s30 = scalar_lea.vmem %s510_s11, 128  ;;  %s3090_s15 = smov [#allocation22]  }
 0x12e   : > { %p2950_p4 = scmp.ne.s32.totalorder %s510_s11, %s2949_s30  ;;  %s2954_s16 = sshll.u32 %s3090_s15, 4  ;;  %s2955_s16 = int_to_ptr.vmem [resolvable:$false] %s2954_s16 }
 0x12f   : > { %s2956_s13 = scalar_lea.vmem %s2955_s16, 256  ;;  %p2957_p10 = scmp.lt.s32.totalorder %s510_s11, %s2955_s16 }
 0x130   : > { %p2952_p13 = pnand %p2950_p4, %p4146_p3  ;;  %p2958_p7 = scmp.lt.s32.totalorder %s2956_s13, %s2949_s30 }
 0x132   : > { %p2953_p9 = pneg %p2952_p13  ;;  %p2959_p0 = por %p2958_p7, %p2957_p10 }
 0x134   : > { %p2960_p5 = pnand %p2959_p0, %p2953_p9 }
 0x136   : > { %2963 = shalt.err (!%p2960_p5)
}
 0x137   : > { %p4147_p12 = scmp.ne.s32.totalorder %s4133_s22, 0  ;;  %s4148_s2 = sld [smem:[#allocation38_spill]] }
 0x139   : > { %2466 = dma.hbm_to_vmem [thread:$0]  (!%p4147_p12), %s507_s10, 128, %s510_s11, %s3277_s28  }
 0x13d   : > { %p4149_p11 = scmp.ne.s32.totalorder %s4148_s2, 0 }
 0x13f   : > { %518 = sbr.rel (%p4149_p11) target bundleno = 1650 (0x672), region = 64 }
 0x146   : > { %s4150_s12 = sld [smem:[#allocation37_spill]] }
 0x14c   : > { %p4151_p2 = scmp.eq.s32.totalorder %s4150_s12, 0 }
 0x14e   : > { %3015 = dma.done.wait (%p4151_p2), [#allocation7], 256   ;;  %p4152_p3 = pmov %p4151_p2 }
 0x14f   : > { %p4153_p1 = pmov %p4151_p2 }
 0x150   : > { %3017 = vsyncadd (%p4152_p3), [#allocation7], 4294967040 }
 0x151   : > { %3019 = dma.done.wait (%p4153_p1), [#allocation10], 256   ;;  %p4154_p6 = pmov %p4153_p1 }
 0x152   : > { %s4155_s0 = sld [smem:[#allocation33_spill]]  ;;  %s528_s26 = sand.u32 1, %s4150_s12  }
 0x153   : > { %3021 = vsyncadd (%p4154_p6), [#allocation10], 4294967040  ;;  %s4156_s22 = sld [smem:[#allocation40_spill]]  ;;  %s529_s17 = scalar_lea.sflag [#allocation7], %s528_s26 }
 0x158   : > { %s530_s28 = sand.u32 1, %s4155_s0  }
 0x159   : > { %s2236_s19 = sshll.u32 %s530_s28, 6  ;;  %p4157_p8 = scmp.ne.s32.totalorder %s4156_s22, 0 }
 0x15a   : > { %s3512_s20 = scalar_lea.vmem [#allocation11], %s2236_s19 }
 0x15b   : > { %3023 = dma.done.wait (%p4157_p8), %s529_s17, 1024  }
 0x15c   : > { %3025 = vsyncadd (%p4157_p8), %s529_s17, 4294966272  ;;  %p4158_p4 = pmov %p4153_p1 }
 0x15d   : > { %p4159_p13 = pmov %p4153_p1 }
 0x15e   : > { %3027 = dma.done.wait (%p4158_p4), [#allocation10], 512  }
 0x15f   : > { %3029 = vsyncadd (%p4159_p13), [#allocation10], 4294966784  ;;  %p4160_p9 = pmov %p4153_p1 }
 0x160   : > { %p4161_p10 = pmov %p4153_p1 }
 0x161   : > { %3031 = dma.done.wait (%p4160_p9), [#allocation14], 256  }
 0x162   : > { %3033 = vsyncadd (%p4161_p10), [#allocation14], 4294967040  ;;  %p4162_p7 = pmov %p4153_p1 }
 0x163   : > { %p4163_p0 = pmov %p4153_p1 }
 0x164   : > { %3035 = dma.done.wait (%p4162_p7), [#allocation17], 1040  }
 0x165   : > { %3037 = vsyncadd (%p4163_p0), [#allocation17], 4294966256  ;;  %p4164_p5 = pmov %p4163_p0 }
 0x166   : > { %p4165_p12 = pmov %p4163_p0 }
 0x167   : > { %3039 = dma.done.wait (%p4164_p5), [#allocation20], 16  }
 0x168   : > { %3041 = vsyncadd (%p4165_p12), [#allocation20], 4294967280  ;;  %s2243_s11 = sshll.u32 %s530_s28, 9 }
 0x169   : > { %s3534_s14 = scalar_lea.vmem [#allocation21], %s2243_s11 }
 0x16a   : > { %3043 = dma.done.wait (%p4157_p8), %s529_s17, 8320  }
 0x16b   : > { %3045 = vsyncadd (%p4157_p8), %s529_s17, 4294958976  ;;  %s2244_s25 = sshll.u32 %s530_s28, 3  ;;  %s4166_s1 = sld [smem:[#allocation35_spill]] }
 0x16c   : > { %s3540_s10 = scalar_lea.vmem [#allocation22], %s2244_s25 }
 0x171   : > { %p2245_p11 = scmp.ne.s32.totalorder %s4166_s1, 0 }
 0x172   : > { %v2554_v0 = vld [vmem:[#allocation15] sm:$0xff] (!%p2245_p11)   ;;  %vm657_vm0 = vcmask (!%p2245_p11), 130048   ;;  %v2555_v1 = vld [vmem:[#allocation9] sm:$0xff] (!%p2245_p11)   ;;  %v2556_v2 = vld [vmem:[#allocation9 + $0x8] sm:$0xff] (!%p2245_p11)   ;;  %vm929_vm1 = vcmask (!%p2245_p11), 7168   ;;  %v3091_v29 = vmov (!%p2245_p11), -inf  }
 0x173   : > { %628 = sbr.rel (%p2245_p11) target bundleno = 831 (0x33f), region = 112  ;;  %2354 = vmatprep.subr.bf16.mxu0 (!%p2245_p11), %v2554_v0  ;;  %2356 = vmatprep.mubr.msk.bf16.mxu0 (!%p2245_p11), %vm657_vm0, %v2555_v1  ;;  %v2557_v3 = vld [vmem:[#allocation13] sm:$0xff] (!%p2245_p11)   ;;  %v2560_v5 = vld [vmem:[#allocation18] sm:$0xff] (!%p2245_p11)   ;;  %v2559_v8 = vld [vmem:[#allocation6 + $0x8] sm:$0xff] (!%p2245_p11)   ;;  %930 = vst.msk [vmem:[#allocation3] sm:$0xff] (!%p2245_p11), %vm929_vm1, %v3091_v29  ;;  %v3092_v30 = vmov (!%p2245_p11), 0.0  }
 0x174   : > { %2355 = vmatpush3.bf16.msra.mxu0 (!%p2245_p11), %v2554_v0  ;;  %v2558_v4 = vld [vmem:[#allocation6] sm:$0xff] (!%p2245_p11)   ;;  %2366 = vmatprep.subr.bf16.mxu1 (!%p2245_p11), %v2560_v5  ;;  %v2563_v9 = vld [vmem:[#allocation18 + $0x18] sm:$0xff] (!%p2245_p11)   ;;  %v2564_v10 = vld [vmem:[#allocation18 + $0x20] sm:$0xff] (!%p2245_p11)   ;;  %931 = vst.msk [vmem:[#allocation3 + $0x8] sm:$0xff] (!%p2245_p11), %vm929_vm1, %v3091_v29 }
 0x175   : > { %2360 = vmatprep.subr.bf16.mxu0 (!%p2245_p11), %v2557_v3  ;;  %v2561_v6 = vld [vmem:[#allocation18 + $0x8] sm:$0xff] (!%p2245_p11)   ;;  %2367 = vmatpush3.bf16.msra.mxu1 (!%p2245_p11), %v2560_v5  ;;  %v2562_v7 = vld [vmem:[#allocation18 + $0x10] sm:$0xff] (!%p2245_p11)   ;;  %v2567_v13 = vld [vmem:[#allocation18 + $0x38] sm:$0xff] (!%p2245_p11)   ;;  %932 = vst.msk [vmem:[#allocation3 + $0x10] sm:$0xff] (!%p2245_p11), %vm929_vm1, %v3091_v29 }
 0x176   : > { %2368 = vmatprep.subr.bf16.mxu1 (!%p2245_p11), %v2561_v6  ;;  %v2565_v11 = vld [vmem:[#allocation18 + $0x28] sm:$0xff] (!%p2245_p11)   ;;  %v2566_v12 = vld [vmem:[#allocation18 + $0x30] sm:$0xff] (!%p2245_p11)   ;;  %v2256_v14 = vld [vmem:[#allocation16] ss:$0 sm:$0xff] (!%p2245_p11)  ;;  %933 = vst.msk [vmem:[#allocation3 + $0x18] sm:$0xff] (!%p2245_p11), %vm929_vm1, %v3091_v29 }
 0x177   : > { %2357 = vmatmul.mubr.msk.bf16.vlgmr.msra.gmra.mrb[0].mxu0 (!%p2245_p11), %vm657_vm0, %v2556_v2  ;;  %934 = vst.msk [vmem:[#allocation4] sm:$0xff] (!%p2245_p11), %vm929_vm1, %v3092_v30  ;;  %935 = vst.msk [vmem:[#allocation4 + $0x8] sm:$0xff] (!%p2245_p11), %vm929_vm1, %v3092_v30  ;;  %v2257_v31 = vld [vmem:[#allocation19] ss:$0 sm:$0xff] (!%p2245_p11) }
 0x178   : > { %2361 = vmatpush3.bf16.msra.mxu0 (!%p2245_p11), %v2557_v3  ;;  %2362 = vmatprep.mubr.msk.bf16.mxu0 (!%p2245_p11), %vm657_vm0, %v2558_v4  ;;  %936 = vst.msk [vmem:[#allocation4 + $0x10] sm:$0xff] (!%p2245_p11), %vm929_vm1, %v3092_v30  ;;  %937 = vst.msk [vmem:[#allocation4 + $0x18] sm:$0xff] (!%p2245_p11), %vm929_vm1, %v3092_v30 }
 0x179   : > { %2369 = vmatpush3.bf16.msra.mxu1 (!%p2245_p11), %v2561_v6  ;;  %938 = vst.msk [vmem:[#allocation5] sm:$0xff] (!%p2245_p11), %vm929_vm1, %v3092_v30  ;;  %939 = vst.msk [vmem:[#allocation5 + $0x8] sm:$0xff] (!%p2245_p11), %vm929_vm1, %v3092_v30 }
 0x17a   : > { %2370 = vmatprep.subr.bf16.mxu1 %v2562_v7  ;;  %940 = vst.msk [vmem:[#allocation5 + $0x10] sm:$0xff] %vm929_vm1, %v3092_v30  ;;  %941 = vst.msk [vmem:[#allocation5 + $0x18] sm:$0xff] %vm929_vm1, %v3092_v30 }
 0x17d   : > { %2371 = vmatpush3.bf16.msra.mxu1 %v2562_v7 }
 0x17e   : > { %2372 = vmatprep.subr.bf16.mxu1 %v2563_v9 }
 0x181   : > { %2373 = vmatpush3.bf16.msra.mxu1 %v2563_v9 }
 0x182   : > { %2374 = vmatprep.subr.bf16.mxu1 %v2564_v10 }
 0x183   : > { %2363 = vmatmul.mubr.msk.bf16.vlgmr.msra.gmra.mrb[0].mxu0 %vm657_vm0, %v2559_v8 }
 0x185   : > { %2375 = vmatpush3.bf16.msra.mxu1 %v2564_v10 }
 0x186   : > { %2376 = vmatprep.subr.bf16.mxu1 %v2565_v11 }
 0x189   : > { %2377 = vmatpush3.bf16.msra.mxu1 %v2565_v11 }
 0x18a   : > { %2378 = vmatprep.subr.bf16.mxu1 %v2566_v12 }
 0x18d   : > { %2379 = vmatpush3.bf16.msra.mxu1 %v2566_v12 }
 0x18e   : > { %2380 = vmatprep.subr.bf16.mxu1 %v2567_v13 }
 0x191   : > { %2381 = vmatpush3.bf16.msra.mxu1 %v2567_v13 }
 0x256   : > { %v2364_v15 = vpop.f32.mrb[0].mxu0 }
 0x257   : > { %v793_v16 = vadd.f32 %v2364_v15, %v2256_v14  ;;  %v769_v17 = vpop.f32.mrb[1].mxu0 }
 0x258   : > { %v791_v18 = vadd.f32 %v2256_v14, %v769_v17  ;;  %v2365_v19 = vpop.f32.mrb[2].mxu0 }
 0x259   : > { %v794_v20 = vadd.f32 %v2365_v19, %v2256_v14  ;;  %v772_v21 = vpop.f32.mrb[3].mxu0  ;;  %v797_v23 = vmax.f32 %v793_v16, 0.0 }
 0x25a   : > { %v792_v22 = vadd.f32 %v2256_v14, %v772_v21  ;;  %v795_v25 = vmax.f32 %v791_v18, 0.0 }
 0x25b   : > { %v798_v24 = vmax.f32 %v794_v20, 0.0 }
 0x25c   : > { %v796_v26 = vmax.f32 %v792_v22, 0.0 }
 0x25d   : > { %v817_v27 = vpack.c.bf16 %v798_v24, %v797_v23 }
 0x25e   : > { %v816_v28 = vpack.c.bf16 %v796_v26, %v795_v25 }
 0x260   : > { %2382 = vmatprep.mubr.bf16.mxu1 %v816_v28 }
 0x261   : > { %2383 = vmatmul.mubr.bf16.vlgmr.msra.gmra.mrb[0].mxu1 %v817_v27 }
 0x334   : > { %v2384_v32 = vpop.f32.mrb[0].mxu1 }
 0x335   : > { %v915_v33 = vadd.f32 %v2384_v32, %v2257_v31  ;;  %v906_v34 = vpop.f32.mrb[1].mxu1 }
 0x336   : > { %v907_v35 = vadd.f32 %v2257_v31, %v906_v34  ;;  %v2385_v36 = vpop.f32.mrb[2].mxu1 }
 0x337   : > { %v918_v37 = vadd.f32 %v2385_v36, %v2257_v31  ;;  %v909_v38 = vpop.f32.mrb[3].mxu1  ;;  %v923_v40 = vmax.f32 %v915_v33, 0.0 }
 0x338   : > { %v910_v39 = vadd.f32 %v2257_v31, %v909_v38  ;;  %v921_v42 = vmax.f32 %v907_v35, 0.0 }
 0x339   : > { %v924_v41 = vmax.f32 %v918_v37, 0.0 }
 0x33a   : > { %v922_v43 = vmax.f32 %v910_v39, 0.0 }
 0x33b   : > { %v926_v44 = vpack.c.bf16 %v924_v41, %v923_v40 }
 0x33c   : > { %v925_v45 = vpack.c.bf16 %v922_v43, %v921_v42 }
 0x33d   : > { %928 = vst [vmem:[#allocation2 + $0x8] sm:$0xff] %v926_v44 }
 0x33e   : > { %927 = vst [vmem:[#allocation2] sm:$0xff] %v925_v45 }
 0x33f PF: > { %v942_v46 = vld [vmem:[%s3534_s14] sm:$0xff]  ;;  %v943_v48 = vld [vmem:[%s3534_s14 + $0x8] sm:$0xff]  ;;  %v3093_v54 = vmov 0   ;;  %v944_v45 = vld [vmem:[%s3534_s14 + $0x10] sm:$0xff]  ;;  %vm1874_vm2 = vcmask 7168   ;;  %s4183_s27 = sld [smem:[#allocation35_spill]] }
 0x340   : > { %v946_v47 = vld [vmem:[%s3534_s14 + $0x20] sm:$0xff]  ;;  %v947_v51 = vld [vmem:[%s3534_s14 + $0x28] sm:$0xff]  ;;  %1402 = vmatprep.mubr.bf16.mxu0 %v3093_v54  ;;  %1455 = vmatprep.mubr.bf16.mxu1 %v3093_v54 }
 0x341   : > { %v2267_v49 = vcombine.high %v942_v46, %v946_v47  ;;  %v2266_v50 = vcombine.low %v942_v46, %v946_v47  ;;  %v950_v52 = vld [vmem:[%s3534_s14 + $0x40] sm:$0xff]  ;;  %v2269_v55 = vcombine.high %v943_v48, %v947_v51  ;;  %v2268_v56 = vcombine.low %v943_v48, %v947_v51  ;;  %v951_v58 = vld [vmem:[%s3534_s14 + $0x48] sm:$0xff]  ;;  %2568 = vset.pattern.permute.xlu0 %v3093_v54  ;;  %v948_v46 = vld [vmem:[%s3534_s14 + $0x30] sm:$0xff] }
 0x342   : > { %v954_v53 = vld [vmem:[%s3534_s14 + $0x60] sm:$0xff]  ;;  %v955_v59 = vld [vmem:[%s3534_s14 + $0x68] sm:$0xff]  ;;  %2569 = vset.pattern.permute.xlu1 %v3093_v54  ;;  %v945_v47 = vld [vmem:[%s3534_s14 + $0x18] sm:$0xff]  ;;  %v2271_v51 = vcombine.high %v944_v45, %v948_v46 }
 0x343   : > { %v2275_v57 = vcombine.high %v950_v52, %v954_v53  ;;  %v958_v60 = vld [vmem:[%s3534_s14 + $0x80] sm:$0xff]  ;;  %1370 = vmatprep.subr.bf16.mxu0 %v2267_v49  ;;  %v2277_v61 = vcombine.high %v951_v58, %v955_v59  ;;  %v959_v63 = vld [vmem:[%s3534_s14 + $0x88] sm:$0xff]  ;;  %1423 = vmatprep.subr.bf16.mxu1 %v2269_v55  ;;  %v2274_v1 = vcombine.low %v950_v52, %v954_v53  ;;  %v949_v48 = vld [vmem:[%s3534_s14 + $0x38] sm:$0xff] }
 0x344   : > { %v962_v62 = vld [vmem:[%s3534_s14 + $0xa0] sm:$0xff]  ;;  %v963_v0 = vld [vmem:[%s3534_s14 + $0xa8] sm:$0xff]  ;;  %1371 = vmatpush1.bf16.msra.mxu0 %v2266_v50  ;;  %1424 = vmatpush1.bf16.msra.mxu1 %v2268_v56  ;;  %v2276_v2 = vcombine.low %v951_v58, %v955_v59  ;;  %v2273_v52 = vcombine.high %v945_v47, %v949_v48  ;;  %v952_v53 = vld [vmem:[%s3534_s14 + $0x50] sm:$0xff]  ;;  %v2270_v59 = vcombine.low %v944_v45, %v948_v46 }
 0x345   : > { %1372 = vmatprep.subr.bf16.mxu0 %v2275_v57  ;;  %v2283_v3 = vcombine.high %v958_v60, %v962_v62  ;;  %1425 = vmatprep.subr.bf16.mxu1 %v2277_v61  ;;  %v2285_v4 = vcombine.high %v959_v63, %v963_v0  ;;  %v966_v5 = vld [vmem:[%s3534_s14 + $0xc0] sm:$0xff]  ;;  %v967_v7 = vld [vmem:[%s3534_s14 + $0xc8] sm:$0xff]  ;;  %v2282_v9 = vcombine.low %v958_v60, %v962_v62  ;;  %v956_v55 = vld [vmem:[%s3534_s14 + $0x70] sm:$0xff]  ;;  %p2330_p2 = scmp.ne.s32.totalorder %s4183_s27, 2 }
 0x346   : > { %v970_v6 = vld [vmem:[%s3534_s14 + $0xe0] sm:$0xff]  ;;  %v971_v8 = vld [vmem:[%s3534_s14 + $0xe8] sm:$0xff]  ;;  %v2284_v10 = vcombine.low %v959_v63, %v963_v0  ;;  %v953_v56 = vld [vmem:[%s3534_s14 + $0x58] sm:$0xff]  ;;  %v2272_v60 = vcombine.low %v945_v47, %v949_v48  ;;  %v2279_v61 = vcombine.high %v952_v53, %v956_v55 }
 0x347   : > { %v2291_v11 = vcombine.high %v966_v5, %v970_v6  ;;  %v2293_v12 = vcombine.high %v967_v7, %v971_v8  ;;  %v974_v13 = vld [vmem:[%s3534_s14 + $0x100] sm:$0xff]  ;;  %v975_v15 = vld [vmem:[%s3534_s14 + $0x108] sm:$0xff]  ;;  %v2290_v17 = vcombine.low %v966_v5, %v970_v6  ;;  %v2292_v18 = vcombine.low %v967_v7, %v971_v8  ;;  %v957_v57 = vld [vmem:[%s3534_s14 + $0x78] sm:$0xff] }
 0x348   : > { %1373 = vmatpush1.bf16.msra.mxu0 %v2274_v1  ;;  %1426 = vmatpush1.bf16.msra.mxu1 %v2276_v2  ;;  %v978_v14 = vld [vmem:[%s3534_s14 + $0x120] sm:$0xff]  ;;  %v979_v16 = vld [vmem:[%s3534_s14 + $0x128] sm:$0xff]  ;;  %v2281_v62 = vcombine.high %v953_v56, %v957_v57  ;;  %v960_v63 = vld [vmem:[%s3534_s14 + $0x90] sm:$0xff] }
 0x349   : > { %1374 = vmatprep.subr.bf16.mxu0 %v2283_v3  ;;  %1427 = vmatprep.subr.bf16.mxu1 %v2285_v4  ;;  %v2299_v19 = vcombine.high %v974_v13, %v978_v14  ;;  %v2301_v20 = vcombine.high %v975_v15, %v979_v16  ;;  %v982_v21 = vld [vmem:[%s3534_s14 + $0x140] sm:$0xff]  ;;  %v983_v23 = vld [vmem:[%s3534_s14 + $0x148] sm:$0xff]  ;;  %v2298_v25 = vcombine.low %v974_v13, %v978_v14  ;;  %v964_v0 = vld [vmem:[%s3534_s14 + $0xb0] sm:$0xff] }
 0x34a   : > { %v986_v22 = vld [vmem:[%s3534_s14 + $0x160] sm:$0xff]  ;;  %v987_v24 = vld [vmem:[%s3534_s14 + $0x168] sm:$0xff]  ;;  %v2300_v26 = vcombine.low %v975_v15, %v979_v16  ;;  %v961_v1 = vld [vmem:[%s3534_s14 + $0x98] sm:$0xff]  ;;  %v2278_v3 = vcombine.low %v952_v53, %v956_v55  ;;  %v2280_v4 = vcombine.low %v953_v56, %v957_v57  ;;  %v2287_v5 = vcombine.high %v960_v63, %v964_v0 }
 0x34b   : > { %v2307_v27 = vcombine.high %v982_v21, %v986_v22  ;;  %v2309_v28 = vcombine.high %v983_v23, %v987_v24  ;;  %v990_v29 = vld [vmem:[%s3534_s14 + $0x180] sm:$0xff]  ;;  %v991_v31 = vld [vmem:[%s3534_s14 + $0x188] sm:$0xff]  ;;  %v2306_v33 = vcombine.low %v982_v21, %v986_v22  ;;  %v2308_v34 = vcombine.low %v983_v23, %v987_v24  ;;  %v965_v2 = vld [vmem:[%s3534_s14 + $0xb8] sm:$0xff] }
 0x34c   : > { %1375 = vmatpush1.bf16.msra.mxu0 %v2282_v9  ;;  %1428 = vmatpush1.bf16.msra.mxu1 %v2284_v10  ;;  %v994_v30 = vld [vmem:[%s3534_s14 + $0x1a0] sm:$0xff]  ;;  %v995_v32 = vld [vmem:[%s3534_s14 + $0x1a8] sm:$0xff]  ;;  %v2289_v6 = vcombine.high %v961_v1, %v965_v2  ;;  %v968_v7 = vld [vmem:[%s3534_s14 + $0xd0] sm:$0xff]  ;;  %v2288_v13 = vcombine.low %v961_v1, %v965_v2 }
 0x34d   : > { %1376 = vmatprep.subr.bf16.mxu0 %v2291_v11  ;;  %1429 = vmatprep.subr.bf16.mxu1 %v2293_v12  ;;  %v2315_v35 = vcombine.high %v990_v29, %v994_v30  ;;  %v2317_v36 = vcombine.high %v991_v31, %v995_v32  ;;  %v998_v37 = vld [vmem:[%s3534_s14 + $0x1c0] sm:$0xff]  ;;  %v999_v39 = vld [vmem:[%s3534_s14 + $0x1c8] sm:$0xff]  ;;  %v2314_v41 = vcombine.low %v990_v29, %v994_v30  ;;  %v972_v8 = vld [vmem:[%s3534_s14 + $0xf0] sm:$0xff] }
 0x34e   : > { %v1002_v38 = vld [vmem:[%s3534_s14 + $0x1e0] sm:$0xff]  ;;  %v1003_v40 = vld [vmem:[%s3534_s14 + $0x1e8] sm:$0xff]  ;;  %v2316_v42 = vcombine.low %v991_v31, %v995_v32  ;;  %v969_v9 = vld [vmem:[%s3534_s14 + $0xd8] sm:$0xff]  ;;  %v2286_v11 = vcombine.low %v960_v63, %v964_v0  ;;  %v2295_v14 = vcombine.high %v968_v7, %v972_v8 }
 0x34f   : > { %v2323_v43 = vcombine.high %v998_v37, %v1002_v38  ;;  %v2325_v44 = vcombine.high %v999_v39, %v1003_v40  ;;  %v2322_v49 = vcombine.low %v998_v37, %v1002_v38  ;;  %v2324_v50 = vcombine.low %v999_v39, %v1003_v40  ;;  %v3591_v58 = vld [vmem:[#allocation2] sm:$0xff]  ;;  %v3605_v12 = vld [vmem:[#allocation2 + $0x8] sm:$0xff]  ;;  %v976_v16 = vld [vmem:[%s3534_s14 + $0x110] sm:$0xff] }
 0x350   : > { %1377 = vmatpush1.bf16.msra.mxu0 %v2290_v17  ;;  %1430 = vmatpush1.bf16.msra.mxu1 %v2292_v18  ;;  %v973_v10 = vld [vmem:[%s3534_s14 + $0xf8] sm:$0xff]  ;;  %v980_v17 = vld [vmem:[%s3534_s14 + $0x130] sm:$0xff]  ;;  %v3656_v63 = vld [vmem:[%s3540_s10] sm:$0xff] }
 0x351   : > { %1378 = vmatprep.subr.bf16.mxu0 %v2299_v19  ;;  %1431 = vmatprep.subr.bf16.mxu1 %v2301_v20  ;;  %v2297_v15 = vcombine.high %v969_v9, %v973_v10  ;;  %v977_v18 = vld [vmem:[%s3534_s14 + $0x118] sm:$0xff]  ;;  %v2294_v20 = vcombine.low %v968_v7, %v972_v8  ;;  %v2296_v21 = vcombine.low %v969_v9, %v973_v10  ;;  %v984_v24 = vld [vmem:[%s3534_s14 + $0x150] sm:$0xff] }
 0x352   : > { %v981_v19 = vld [vmem:[%s3534_s14 + $0x138] sm:$0xff]  ;;  %v2303_v22 = vcombine.high %v976_v16, %v980_v17  ;;  %v992_v32 = vld [vmem:[%s3534_s14 + $0x190] sm:$0xff] }
 0x353   : > { %v2305_v23 = vcombine.high %v977_v18, %v981_v19  ;;  %v2304_v29 = vcombine.low %v977_v18, %v981_v19  ;;  %v1000_v40 = vld [vmem:[%s3534_s14 + $0x1d0] sm:$0xff]  ;;  %v3661_v2 = vld [vmem:[%s3512_s20 + $0x10] sm:$0xff] }
 0x354   : > { %1379 = vmatpush1.bf16.msra.mxu0 %v2298_v25  ;;  %1432 = vmatpush1.bf16.msra.mxu1 %v2300_v26  ;;  %v988_v25 = vld [vmem:[%s3534_s14 + $0x170] sm:$0xff]  ;;  %v985_v26 = vld [vmem:[%s3534_s14 + $0x158] sm:$0xff]  ;;  %v1608_v8 = vunpack.c.2.s8 %v3661_v2 }
 0x355   : > { %1380 = vmatprep.subr.bf16.mxu0 %v2307_v27  ;;  %1433 = vmatprep.subr.bf16.mxu1 %v2309_v28  ;;  %v989_v27 = vld [vmem:[%s3534_s14 + $0x178] sm:$0xff]  ;;  %v2302_v28 = vcombine.low %v976_v16, %v980_v17  ;;  %v2311_v30 = vcombine.high %v984_v24, %v988_v25  ;;  %v3642_v56 = vld [vmem:[%s3512_s20] sm:$0xff] }
 0x356   : > { %v2313_v31 = vcombine.high %v985_v26, %v989_v27  ;;  %v2312_v37 = vcombine.low %v985_v26, %v989_v27  ;;  %v1614_v7 = vunpack.c.3.s8 %v3642_v56 }
 0x358   : > { %1381 = vmatpush1.bf16.msra.mxu0 %v2306_v33  ;;  %1434 = vmatpush1.bf16.msra.mxu1 %v2308_v34  ;;  %v996_v33 = vld [vmem:[%s3534_s14 + $0x1b0] sm:$0xff]  ;;  %v993_v34 = vld [vmem:[%s3534_s14 + $0x198] sm:$0xff] }
 0x359   : > { %1382 = vmatprep.subr.bf16.mxu0 %v2315_v35  ;;  %1435 = vmatprep.subr.bf16.mxu1 %v2317_v36  ;;  %v997_v35 = vld [vmem:[%s3534_s14 + $0x1b8] sm:$0xff]  ;;  %v2310_v36 = vcombine.low %v984_v24, %v988_v25  ;;  %v2319_v38 = vcombine.high %v992_v32, %v996_v33 }
 0x35a   : > { %v2321_v39 = vcombine.high %v993_v34, %v997_v35  ;;  %v2320_v45 = vcombine.low %v993_v34, %v997_v35 }
 0x35c   : > { %1383 = vmatpush1.bf16.msra.mxu0 %v2314_v41  ;;  %1436 = vmatpush1.bf16.msra.mxu1 %v2316_v42  ;;  %v1004_v41 = vld [vmem:[%s3534_s14 + $0x1f0] sm:$0xff]  ;;  %v1001_v42 = vld [vmem:[%s3534_s14 + $0x1d8] sm:$0xff] }
 0x35d   : > { %1384 = vmatprep.subr.bf16.mxu0 %v2323_v43  ;;  %1437 = vmatprep.subr.bf16.mxu1 %v2325_v44  ;;  %v1005_v43 = vld [vmem:[%s3534_s14 + $0x1f8] sm:$0xff]  ;;  %v2318_v44 = vcombine.low %v992_v32, %v996_v33  ;;  %v2327_v46 = vcombine.high %v1000_v40, %v1004_v41  ;;  %v2326_v48 = vcombine.low %v1000_v40, %v1004_v41 }
 0x35e   : > { %v2329_v47 = vcombine.high %v1001_v42, %v1005_v43 }
 0x360   : > { %1385 = vmatpush1.bf16.msra.mxu0 %v2322_v49  ;;  %1438 = vmatpush1.bf16.msra.mxu1 %v2324_v50  ;;  %v2328_v49 = vcombine.low %v1001_v42, %v1005_v43  ;;  %v1010_v50 = vlaneseq }
 0x361   : > { %1476 = vmatprep.subr.bf16.mxu0 %v2271_v51  ;;  %1529 = vmatprep.subr.bf16.mxu1 %v2273_v52 }
 0x362   : > { %v3633_v51 = vshrl.u32 %v1010_v50, 7 }
 0x363   : > { %1403 = vmatmul.mubr.bf16.vlgmr.msra.gmra.mrb[0].mxu0 %v3591_v58  ;;  %1456 = vmatmul.mubr.bf16.vlgmr.msra.gmra.mrb[0].mxu1 %v3591_v58 }
 0x364   : > { %1477 = vmatpush1.bf16.msra.mxu0 %v2270_v59  ;;  %1530 = vmatpush1.bf16.msra.mxu1 %v2272_v60  ;;  %v3650_v59 = vld [vmem:[%s3512_s20 + $0x8] sm:$0xff]  ;;  %v1016_v0 = vsub.s32 1, %v3633_v51  ;;  %v1020_v1 = vsub.s32 2, %v3633_v51 }
 0x365   : > { %1478 = vmatprep.subr.bf16.mxu0 %v2279_v61  ;;  %1531 = vmatprep.subr.bf16.mxu1 %v2281_v62  ;;  %v1606_v62 = vunpack.c.2.s8 %v3642_v56  ;;  %v1615_v9 = vunpack.c.3.s8 %v3650_v59 }
 0x366   : > { %1412 = vmatprep.mubr.bf16.mxu0 %v3093_v54  ;;  %1465 = vmatprep.mubr.bf16.mxu1 %v3093_v54 }
 0x367   : > { %v1647_v27 = vcvt.s32.f32 %v1615_v9 }
 0x368   : > { %1479 = vmatpush1.bf16.msra.mxu0 %v2278_v3  ;;  %1532 = vmatpush1.bf16.msra.mxu1 %v2280_v4  ;;  %v1024_v3 = vsub.s32 3, %v3633_v51 }
 0x369   : > { %1480 = vmatprep.subr.bf16.mxu0 %v2287_v5  ;;  %1533 = vmatprep.subr.bf16.mxu1 %v2289_v6  ;;  %v1607_v5 = vunpack.c.2.s8 %v3650_v59  ;;  %v3668_v6 = vld [vmem:[%s3512_s20 + $0x18] sm:$0xff] }
 0x36a   : > { %v1609_v10 = vunpack.c.2.s8 %v3668_v6  ;;  %v3679_v16 = vrot.slane %v3656_v63, %v1024_v3  ;;  %v1617_v24 = vunpack.c.3.s8 %v3668_v6 }
 0x36b   : > { %1413 = vmatmul.mubr.bf16.gmra.mrb[4].mxu0 %v3605_v12  ;;  %1466 = vmatmul.mubr.bf16.gmra.mrb[4].mxu1 %v3605_v12  ;;  %v1639_v18 = vcvt.s32.f32 %v1607_v5 }
 0x36c   : > { %1481 = vmatpush1.bf16.msra.mxu0 %v2286_v11  ;;  %1534 = vmatpush1.bf16.msra.mxu1 %v2288_v13  ;;  %v1616_v11 = vunpack.c.3.s8 %v3661_v2  ;;  %v1638_v13 = vcvt.s32.f32 %v1606_v62  ;;  %v1649_v43 = vcvt.s32.f32 %v1617_v24 }
 0x36d   : > { %1482 = vmatprep.subr.bf16.mxu0 %v2295_v14  ;;  %1535 = vmatprep.subr.bf16.mxu1 %v2297_v15  ;;  %v1017_v14 = vrot.slane %v3656_v63, %v1016_v0  ;;  %v1021_v15 = vrot.slane %v3656_v63, %v1020_v1 }
 0x36e   : > { %1508 = vmatprep.mubr.bf16.mxu0 %v3093_v54  ;;  %1561 = vmatprep.mubr.bf16.mxu1 %v3093_v54 }
 0x370   : > { %1483 = vmatpush1.bf16.msra.mxu0 %v2294_v20  ;;  %1536 = vmatpush1.bf16.msra.mxu1 %v2296_v21  ;;  %v1646_v21 = vcvt.s32.f32 %v1614_v7 }
 0x371   : > { %1484 = vmatprep.subr.bf16.mxu0 %v2303_v22  ;;  %1537 = vmatprep.subr.bf16.mxu1 %v2305_v23  ;;  %v1640_v23 = vcvt.s32.f32 %v1608_v8 }
 0x374   : > { %1485 = vmatpush1.bf16.msra.mxu0 %v2302_v28  ;;  %1538 = vmatpush1.bf16.msra.mxu1 %v2304_v29  ;;  %v1641_v29 = vcvt.s32.f32 %v1609_v10 }
 0x375   : > { %1486 = vmatprep.subr.bf16.mxu0 %v2311_v30  ;;  %1539 = vmatprep.subr.bf16.mxu1 %v2313_v31  ;;  %v1648_v30 = vcvt.s32.f32 %v1616_v11  ;;  %v1028_v11 = vsub.s32 4, %v3633_v51 }
 0x378   : > { %1487 = vmatpush1.bf16.msra.mxu0 %v2310_v36  ;;  %1540 = vmatpush1.bf16.msra.mxu1 %v2312_v37 }
 0x379   : > { %1488 = vmatprep.subr.bf16.mxu0 %v2319_v38  ;;  %1541 = vmatprep.subr.bf16.mxu1 %v2321_v39 }
 0x37c   : > { %1489 = vmatpush1.bf16.msra.mxu0 %v2318_v44  ;;  %1542 = vmatpush1.bf16.msra.mxu1 %v2320_v45 }
 0x37d   : > { %1490 = vmatprep.subr.bf16.mxu0 %v2327_v46  ;;  %1543 = vmatprep.subr.bf16.mxu1 %v2329_v47 }
 0x380   : > { %1491 = vmatpush1.bf16.msra.mxu0 %v2326_v48  ;;  %1544 = vmatpush1.bf16.msra.mxu1 %v2328_v49 }
 0x383   : > { %1509 = vmatmul.mubr.bf16.vlgmr.msra.gmra.mrb[8].mxu0 %v3591_v58  ;;  %1562 = vmatmul.mubr.bf16.vlgmr.msra.gmra.mrb[8].mxu1 %v3591_v58  ;;  %v1012_v58 = vsub.s32 0, %v3633_v51 }
 0x384   : > { %1518 = vmatprep.mubr.bf16.mxu0 %v3093_v54  ;;  %1571 = vmatprep.mubr.bf16.mxu1 %v3093_v54 }
 0x38b   : > { %1519 = vmatmul.mubr.bf16.gmra.mrb[12].mxu0 %v3605_v12  ;;  %1572 = vmatmul.mubr.bf16.gmra.mrb[12].mxu1 %v3605_v12  ;;  %v1013_v12 = vrot.slane %v3656_v63, %v1012_v58 }
 0x436   : > { %v3635_v52 = vpop.f32.mrb[0].mxu0  ;;  %v3639_v55 = vpop.f32.mrb[0].mxu1 }
 0x437   : > { %v3637_v53 = vpop.f32.mrb[1].mxu0  ;;  %v3646_v54 = vpop.f32.mrb[1].mxu1  ;;  %v3713_v3 = vadd.f32 %v3635_v52, %v1013_v12  ;;  %v3726_v10 = vadd.f32 %v3639_v55, %v1021_v15  ;;  %v1032_v52 = vsub.s32 5, %v3633_v51  ;;  %v3742_v55 = vrot.slane %v3656_v63, %v1028_v11 }
 0x438   : > { %v3644_v57 = vpop.f32.mrb[2].mxu0  ;;  %v3652_v61 = vpop.f32.mrb[2].mxu1  ;;  %v3716_v5 = vadd.f32 %v3637_v53, %v1017_v14 }
 0x439   : > { %v1410_v60 = vpop.f32.mrb[3].mxu0  ;;  %v3664_v4 = vpop.f32.mrb[3].mxu1  ;;  %v3719_v7 = vadd.f32 %v3644_v57, %v1013_v12  ;;  %v1036_v57 = vsub.s32 6, %v3633_v51 }
 0x43a   : > { %v3721_v8 = vadd.f32 %v1410_v60, %v1017_v14  ;;  %v1658_v9 = vmax.f32 %v3713_v3, %v3716_v5  ;;  %v3763_v24 = vadd.f32 %v3664_v4, %v3679_v16 }
 0x43c   : > { %v1667_v53 = vmax.f32 %v3719_v7, %v3721_v8  ;;  %v1659_v60 = vmax.f32 %v1658_v9, %v3726_v10 }
 0x43e   : > { %v1414_v17 = vpop.f32.mrb[4].mxu0  ;;  %v1467_v22 = vpop.f32.mrb[4].mxu1 }
 0x43f   : > { %v3681_v19 = vadd.f32 %v1414_v17, %v1013_v12  ;;  %v1416_v20 = vpop.f32.mrb[5].mxu0  ;;  %v1469_v28 = vpop.f32.mrb[5].mxu1  ;;  %v3689_v34 = vadd.f32 %v1467_v22, %v1021_v15 }
 0x440   : > { %v3684_v25 = vadd.f32 %v1416_v20, %v1017_v14  ;;  %v1418_v26 = vpop.f32.mrb[6].mxu0  ;;  %v3692_v35 = vadd.f32 %v1469_v28, %v3679_v16  ;;  %v1471_v36 = vpop.f32.mrb[6].mxu1  ;;  %v3755_v20 = vrot.slane %v3656_v63, %v1036_v57 }
 0x441   : > { %v1903_v31 = vmul.f32 %v1638_v13, %v3681_v19  ;;  %v3687_v32 = vadd.f32 %v1418_v26, %v1013_v12  ;;  %v1420_v33 = vpop.f32.mrb[7].mxu0  ;;  %v1473_v39 = vpop.f32.mrb[7].mxu1  ;;  %v1905_v41 = vmul.f32 %v1640_v23, %v3689_v34  ;;  %v3699_v42 = vadd.f32 %v1471_v36, %v1021_v15 }
 0x442   : > { %4167 = vst [vmem:[#allocation42_spill] sm:$0xff] %v3692_v35  ;;  %v1904_v37 = vmul.f32 %v1639_v18, %v3684_v25  ;;  %v3695_v38 = vadd.f32 %v1420_v33, %v1017_v14  ;;  %v1906_v46 = vmul.f32 %v1641_v29, %v3692_v35  ;;  %v3705_v48 = vadd.f32 %v1473_v39, %v3679_v16  ;;  %v3749_v18 = vld [vmem:[%s3512_s20 + $0x20] sm:$0xff] }
 0x443   : > { %v1911_v40 = vmul.f32 %v1646_v21, %v3687_v32  ;;  %4168 = vst [vmem:[#allocation43_spill] sm:$0xff] %v3699_v42  ;;  %v1913_v47 = vmul.f32 %v1648_v30, %v3699_v42  ;;  %v3733_v13 = vadd.f32 %v3652_v61, %v1021_v15  ;;  %v3739_v12 = vadd.f32 %v3646_v54, %v3679_v16  ;;  %v3752_v61 = vld [vmem:[%s3512_s20 + $0x28] sm:$0xff]  ;;  %v3771_v30 = vld [vmem:[%s3512_s20 + $0x30] sm:$0xff] }
 0x444   : > { %v1937_v44 = vadd.f32 %v1904_v37, %v1903_v31  ;;  %v1912_v45 = vmul.f32 %v1647_v27, %v3695_v38  ;;  %v1914_v58 = vmul.f32 %v1649_v43, %v3705_v48  ;;  %v3745_v14 = vrot.slane %v3656_v63, %v1032_v52 }
 0x445   : > { %v1668_v17 = vmax.f32 %v1667_v53, %v3733_v13  ;;  %v1040_v54 = vsub.s32 7, %v3633_v51  ;;  %v1610_v21 = vunpack.c.2.s8 %v3749_v18  ;;  %v1611_v22 = vunpack.c.2.s8 %v3752_v61 }
 0x446   : > { %v1946_v49 = vadd.f32 %v1912_v45, %v1911_v40  ;;  %v1938_v50 = vadd.f32 %v1937_v44, %v1905_v41  ;;  %v1660_v23 = vmax.f32 %v1659_v60, %v3739_v12  ;;  %v1676_v26 = vmax.f32 %v3681_v19, %v3684_v25 }
 0x447   : > { %v1612_v36 = vunpack.c.2.s8 %v3771_v30  ;;  %v1618_v4 = vunpack.c.3.s8 %v3749_v18  ;;  %v1619_v16 = vunpack.c.3.s8 %v3752_v61  ;;  %v1669_v37 = vmax.f32 %v1668_v17, %v3763_v24 }
 0x448   : > { %v3708_v62 = vadd.f32 %v1938_v50, %v1906_v46  ;;  %v1947_v0 = vadd.f32 %v1946_v49, %v1913_v47  ;;  %v1685_v39 = vmax.f32 %v3687_v32, %v3695_v38  ;;  %v1041_v46 = vrot.slane %v3656_v63, %v1040_v54 }
 0x449   : > { %v1620_v50 = vunpack.c.3.s8 %v3771_v30  ;;  %v1642_v52 = vcvt.s32.f32 %v1610_v21  ;;  %v1643_v53 = vcvt.s32.f32 %v1611_v22  ;;  %v1650_v57 = vcvt.s32.f32 %v1618_v4 }
 0x44a   : > { %v3710_v1 = vadd.f32 %v1947_v0, %v1914_v58  ;;  %v3795_v58 = vld [vmem:[%s3512_s20 + $0x38] sm:$0xff]  ;;  %v1677_v0 = vmax.f32 %v1676_v26, %v3689_v34  ;;  %v1686_v63 = vmax.f32 %v1685_v39, %v3699_v42  ;;  %v1651_v54 = vcvt.s32.f32 %v1619_v16 }
 0x44b   : > { %v1613_v11 = vunpack.c.2.s8 %v3795_v58 }
 0x44c   : > { %v1678_v21 = vmax.f32 %v1677_v0, %v3692_v35  ;;  %v1687_v0 = vmax.f32 %v1686_v63, %v3705_v48 }
 0x44d   : > { %v1645_v39 = vcvt.s32.f32 %v1613_v11 }
 0x456   : > { %v1510_v15 = vpop.f32.mrb[8].mxu0  ;;  %v1563_v29 = vpop.f32.mrb[8].mxu1 }
 0x457   : > { %v3768_v27 = vadd.f32 %v1510_v15, %v3742_v55  ;;  %v1512_v28 = vpop.f32.mrb[9].mxu0  ;;  %v1565_v33 = vpop.f32.mrb[9].mxu1  ;;  %v3787_v45 = vadd.f32 %v1563_v29, %v3755_v20  ;;  %v1644_v15 = vcvt.s32.f32 %v1612_v36  ;;  %v1652_v29 = vcvt.s32.f32 %v1620_v50 }
 0x458   : > { %v3774_v51 = vadd.f32 %v1512_v28, %v3745_v14  ;;  %v1514_v31 = vpop.f32.mrb[10].mxu0  ;;  %v1567_v44 = vpop.f32.mrb[10].mxu1  ;;  %v1621_v36 = vunpack.c.3.s8 %v3795_v58 }
 0x459   : > { %v1661_v40 = vmax.f32 %v1660_v23, %v3768_v27  ;;  %v3784_v41 = vadd.f32 %v1514_v31, %v3742_v55  ;;  %v1516_v43 = vpop.f32.mrb[11].mxu0  ;;  %v1569_v49 = vpop.f32.mrb[11].mxu1  ;;  %v3803_v23 = vadd.f32 %v1565_v33, %v1041_v46  ;;  %v3806_v28 = vadd.f32 %v1567_v44, %v3755_v20 }
 0x45a   : > { %v3791_v47 = vadd.f32 %v1516_v43, %v3745_v14  ;;  %v3828_v35 = vadd.f32 %v1569_v49, %v1041_v46 }
 0x45b   : > { %v1670_v9 = vmax.f32 %v1669_v37, %v3784_v41  ;;  %v1662_v60 = vmax.f32 %v1661_v40, %v3774_v51 }
 0x45d   : > { %v1671_v17 = vmax.f32 %v1670_v9, %v3791_v47  ;;  %v1663_v31 = vmax.f32 %v1662_v60, %v3787_v45 }
 0x45e   : > { %v1520_v26 = vpop.f32.mrb[12].mxu0  ;;  %v1573_v37 = vpop.f32.mrb[12].mxu1 }
 0x45f   : > { %v3811_v22 = vadd.f32 %v1520_v26, %v3742_v55  ;;  %v1522_v4 = vpop.f32.mrb[13].mxu0  ;;  %v3818_v16 = vadd.f32 %v1573_v37, %v3755_v20  ;;  %v1575_v43 = vpop.f32.mrb[13].mxu1  ;;  %v1664_v44 = vmax.f32 %v1663_v31, %v3803_v23  ;;  %v1672_v50 = vmax.f32 %v1671_v17, %v3806_v28 }
 0x460   : > { %v3815_v33 = vadd.f32 %v1522_v4, %v3745_v14  ;;  %v1524_v40 = vpop.f32.mrb[14].mxu0  ;;  %v1577_v4 = vpop.f32.mrb[14].mxu1  ;;  %v3831_v42 = vadd.f32 %v1575_v43, %v1041_v46 }
 0x461   : > { %v1679_v9 = vmax.f32 %v1678_v21, %v3811_v22  ;;  %v1907_v11 = vmul.f32 %v1642_v52, %v3811_v22  ;;  %v3826_v60 = vadd.f32 %v1524_v40, %v3742_v55  ;;  %v1526_v26 = vpop.f32.mrb[15].mxu0  ;;  %1665 = vmax.xlane.f32.xlu0 %v1664_v44  ;;  %v1579_v63 = vpop.f32.mrb[15].mxu1  ;;  %v3840_v21 = vadd.f32 %v1577_v4, %v3755_v20 }
 0x462   : > { %v1908_v37 = vmul.f32 %v1643_v53, %v3815_v33  ;;  %v3834_v31 = vadd.f32 %v1526_v26, %v3745_v14  ;;  %v1909_v49 = vmul.f32 %v1644_v15, %v3818_v16  ;;  %v1673_v40 = vmax.f32 %v1672_v50, %v3828_v35 }
 0x463   : > { %v1940_v17 = vadd.f32 %v3708_v62, %v1907_v11  ;;  %v1688_v52 = vmax.f32 %v1687_v0, %v3826_v60  ;;  %v1915_v55 = vmul.f32 %v1650_v57, %v3826_v60  ;;  %v1680_v14 = vmax.f32 %v1679_v9, %v3815_v33 }
 0x464   : > { %v1916_v53 = vmul.f32 %v1651_v54, %v3834_v31  ;;  %v3848_v62 = vadd.f32 %v1579_v63, %v1041_v46  ;;  %v1653_v0 = vcvt.s32.f32 %v1621_v36  ;;  %v1917_v11 = vmul.f32 %v1652_v29, %v3840_v21  ;;  %v3861_v29 = vld [vmem:[#allocation3] sm:$0xff] }
 0x465   : > { %v1949_v43 = vadd.f32 %v3710_v1, %v1915_v55  ;;  %v1689_v44 = vmax.f32 %v1688_v52, %v3834_v31  ;;  %1674 = vmax.xlane.f32.xlu0 %v1673_v40  ;;  %v1681_v57 = vmax.f32 %v1680_v14, %v3818_v16  ;;  %v1941_v20 = vadd.f32 %v1940_v17, %v1908_v37 }
 0x466   : > { %v1910_v9 = vmul.f32 %v1645_v39, %v3831_v42  ;;  %v1918_v1 = vmul.f32 %v1653_v0, %v3848_v62  ;;  %v3866_v39 = vld [vmem:[#allocation3 + $0x8] sm:$0xff]  ;;  %v1594_v40 = vunpack.c.0.s8 %v3749_v18 }
 0x467   : > { %v1950_v15 = vadd.f32 %v1949_v43, %v1916_v53  ;;  %v1682_v54 = vmax.f32 %v1681_v57, %v3831_v42  ;;  %v1690_v50 = vmax.f32 %v1689_v44, %v3840_v21  ;;  %v1942_v26 = vadd.f32 %v1941_v20, %v1909_v49  ;;  %v3876_v53 = vld [vmem:[#allocation3 + $0x10] sm:$0xff]  ;;  %v3886_v44 = vld [vmem:[#allocation3 + $0x18] sm:$0xff] }
 0x468   : > { %4169 = vst [vmem:[#allocation44_spill] sm:$0xff] %v3876_v53  ;;  %4171 = vst [vmem:[#allocation46_spill] sm:$0xff] %v3886_v44 }
 0x469   : > { %v1951_v4 = vadd.f32 %v1950_v15, %v1917_v11  ;;  %1683 = vmax.xlane.f32.xlu1 %v1682_v54  ;;  %v3856_v46 = vadd.f32 %v1942_v26, %v1910_v9  ;;  %v1691_v37 = vmax.f32 %v1690_v50, %v3848_v62  ;;  %v1590_v11 = vunpack.c.0.s8 %v3642_v56 }
 0x46a   : > { %v1591_v15 = vunpack.c.0.s8 %v3650_v59  ;;  %v1598_v50 = vunpack.c.1.s8 %v3642_v56 }
 0x46b   : > { %v3858_v36 = vadd.f32 %v1951_v4, %v1918_v1  ;;  %v1622_v9 = vcvt.s32.f32 %v1590_v11  ;;  %v1592_v1 = vunpack.c.0.s8 %v3661_v2  ;;  %v1599_v4 = vunpack.c.1.s8 %v3650_v59 }
 0x46c   : > { %v1623_v26 = vcvt.s32.f32 %v1591_v15 }
 0x46d   : > { %1692 = vmax.xlane.f32.xlu1 %v1691_v37  ;;  %v1630_v37 = vcvt.s32.f32 %v1598_v50  ;;  %v1624_v54 = vcvt.s32.f32 %v1592_v1  ;;  %v1631_v0 = vcvt.s32.f32 %v1599_v4 }
 0x46f   : > { %v1895_v52 = vmul.f32 %v1630_v37, %v3719_v7  ;;  %v1889_v59 = vmul.f32 %v1624_v54, %v3726_v10  ;;  %v1896_v50 = vmul.f32 %v1631_v0, %v3721_v8  ;;  %v1603_v37 = vunpack.c.1.s8 %v3752_v61 }
 0x471   : > { %v1928_v4 = vadd.f32 %v1896_v50, %v1895_v52 }
 0x4ee   : > { %v1666_v63 = vpop.xlane.xlu0 %1665 }
 0x4ef   : > { %v3864_v17 = vmax.f32 %v3861_v29, %v1666_v63  ;;  %v1593_v63 = vunpack.c.0.s8 %v3668_v6 }
 0x4f1   : > { %1879 = vst.msk [vmem:[#allocation3] sm:$0xff] %vm1874_vm2, %v3864_v17  ;;  %1720 = vperm.xlu0 %2568, %v3864_v17   ;;  %v1625_v56 = vcvt.s32.f32 %v1593_v63 }
 0x4f2   : > { %v1675_v55 = vpop.xlane.xlu0 %1674 }
 0x4f3   : > { %v3874_v49 = vmax.f32 %v3866_v39, %v1675_v55  ;;  %v1600_v55 = vunpack.c.1.s8 %v3661_v2  ;;  %v1626_v2 = vcvt.s32.f32 %v1594_v40 }
 0x4f5   : > { %1880 = vst.msk [vmem:[#allocation3 + $0x8] sm:$0xff] %vm1874_vm2, %v3874_v49  ;;  %1725 = vperm.xlu1 %2569, %v3874_v49   ;;  %v1632_v11 = vcvt.s32.f32 %v1600_v55  ;;  %v1596_v55 = vunpack.c.0.s8 %v3771_v30  ;;  %v1891_v0 = vmul.f32 %v1626_v2, %v3768_v27 }
 0x4f6   : > { %v1684_v14 = vpop.xlane.xlu1 %1683 }
 0x4f7   : > { %v3884_v43 = vmax.f32 %v3876_v53, %v1684_v14  ;;  %v1887_v14 = vmul.f32 %v1622_v9, %v3713_v3  ;;  %v1595_v9 = vunpack.c.0.s8 %v3752_v61  ;;  %v1897_v63 = vmul.f32 %v1632_v11, %v3733_v13 }
 0x4f8   : > { %v1635_v53 = vcvt.s32.f32 %v1603_v37  ;;  %v1597_v61 = vunpack.c.0.s8 %v3795_v58 }
 0x4f9   : > { %4170 = vst [vmem:[#allocation45_spill] sm:$0xff] %v3884_v43  ;;  %1881 = vst.msk [vmem:[#allocation3 + $0x10] sm:$0xff] %vm1874_vm2, %v3884_v43  ;;  %1730 = vperm.xlu1 %2569, %v3884_v43   ;;  %v1628_v43 = vcvt.s32.f32 %v1596_v55 }
 0x4fa   : > { %v1693_v57 = vpop.xlane.xlu1 %1692 }
 0x4fb   : > { %v3894_v20 = vmax.f32 %v3886_v44, %v1693_v57  ;;  %v1888_v57 = vmul.f32 %v1623_v26, %v3716_v5  ;;  %v1602_v26 = vunpack.c.1.s8 %v3749_v18  ;;  %v1890_v44 = vmul.f32 %v1625_v56, %v3739_v12 }
 0x4fd   : > { %4172 = vst [vmem:[#allocation47_spill] sm:$0xff] %v3894_v20  ;;  %1882 = vst.msk [vmem:[#allocation3 + $0x18] sm:$0xff] %vm1874_vm2, %v3894_v20  ;;  %1735 = vperm.xlu1 %2569, %v3894_v20   ;;  %v1919_v15 = vadd.f32 %v1888_v57, %v1887_v14  ;;  %v1601_v20 = vunpack.c.1.s8 %v3668_v6  ;;  %v1627_v14 = vcvt.s32.f32 %v1595_v9  ;;  %v1634_v6 = vcvt.s32.f32 %v1602_v26 }
 0x4fe   : > { %v1929_v57 = vadd.f32 %v1928_v4, %v1897_v63  ;;  %v1629_v26 = vcvt.s32.f32 %v1597_v61 }
 0x4ff   : > { %v1920_v1 = vadd.f32 %v1919_v15, %v1889_v59  ;;  %v1633_v54 = vcvt.s32.f32 %v1601_v20  ;;  %v1892_v56 = vmul.f32 %v1627_v14, %v3774_v51  ;;  %v1899_v11 = vmul.f32 %v1634_v6, %v3784_v41 }
 0x500   : > { %v1604_v59 = vunpack.c.1.s8 %v3771_v30  ;;  %v1893_v20 = vmul.f32 %v1628_v43, %v3787_v45  ;;  %v1894_v37 = vmul.f32 %v1629_v26, %v3803_v23 }
 0x501   : > { %v1921_v40 = vadd.f32 %v1920_v1, %v1890_v44  ;;  %v1898_v18 = vmul.f32 %v1633_v54, %v3763_v24  ;;  %v1900_v44 = vmul.f32 %v1635_v53, %v3791_v47  ;;  %v1605_v1 = vunpack.c.1.s8 %v3795_v58 }
 0x502   : > { %v1636_v9 = vcvt.s32.f32 %v1604_v59 }
 0x503   : > { %v1922_v52 = vadd.f32 %v1921_v40, %v1891_v0  ;;  %v1930_v15 = vadd.f32 %v1929_v57, %v1898_v18  ;;  %v1637_v54 = vcvt.s32.f32 %v1605_v1 }
 0x504   : > { %v1901_v55 = vmul.f32 %v1636_v9, %v3806_v28 }
 0x505   : > { %v1931_v50 = vadd.f32 %v1930_v15, %v1899_v11  ;;  %v1923_v2 = vadd.f32 %v1922_v52, %v1892_v56  ;;  %v1902_v43 = vmul.f32 %v1637_v54, %v3828_v35 }
 0x507   : > { %v1924_v4 = vadd.f32 %v1923_v2, %v1893_v20  ;;  %v1932_v63 = vadd.f32 %v1931_v50, %v1900_v44 }
 0x509   : > { %v1925_v30 = vadd.f32 %v1924_v4, %v1894_v37  ;;  %v1933_v0 = vadd.f32 %v1932_v63, %v1901_v55 }
 0x50b   : > { %v1934_v14 = vadd.f32 %v1933_v0, %v1902_v43 }
 0x521   : > { %1926 = vadd.xlane.f32.xlu1 %v1925_v30 }
 0x525   : > { %1935 = vadd.xlane.f32.xlu1 %v1934_v14 }
 0x570   : > { %v1721_v53 = vpop.permute.xlu0 %1720 }
 0x571   : > { %v1738_v6 = vsub.f32 %v3713_v3, %v1721_v53  ;;  %v1739_v40 = vsub.f32 %v3716_v5, %v1721_v53  ;;  %v1740_v58 = vsub.f32 %v3726_v10, %v1721_v53  ;;  %v1741_v57 = vsub.f32 %v3739_v12, %v1721_v53 }
 0x572   : > { %v1742_v15 = vsub.f32 %v3768_v27, %v1721_v53  ;;  %v1743_v50 = vsub.f32 %v3774_v51, %v1721_v53  ;;  %v1744_v9 = vsub.f32 %v3787_v45, %v1721_v53 }
 0x573   : > { %v1770_v18 = vmul.f32 1.442695, %v1738_v6  ;;  %v1772_v52 = vmul.f32 1.442695, %v1739_v40  ;;  %v1774_v56 = vmul.f32 1.442695, %v1740_v58 }
 0x574   : > { %v3937_v11 = vpop.permute.xlu1 %1725  ;;  %v1776_v59 = vmul.f32 1.442695, %v1741_v57  ;;  %v1778_v27 = vmul.f32 1.442695, %v1742_v15  ;;  %v1780_v26 = vmul.f32 1.442695, %v1743_v50 }
 0x575   : > { %2570 = vpow2.f32 %v1770_v18  ;;  %v1746_v61 = vsub.f32 %v3719_v7, %v3937_v11  ;;  %v1747_v3 = vsub.f32 %v3721_v8, %v3937_v11  ;;  %v1748_v5 = vsub.f32 %v3733_v13, %v3937_v11  ;;  %v4174_v6 = vld [vmem:[#allocation42_spill] sm:$0xff] }
 0x576   : > { %2572 = vpow2.f32 %v1772_v52  ;;  %v1749_v4 = vsub.f32 %v3763_v24, %v3937_v11  ;;  %v1782_v30 = vmul.f32 1.442695, %v1744_v9  ;;  %v1752_v18 = vsub.f32 %v3806_v28, %v3937_v11 }
 0x577   : > { %v1786_v10 = vmul.f32 1.442695, %v1746_v61  ;;  %v1788_v12 = vmul.f32 1.442695, %v1747_v3  ;;  %2574 = vpow2.f32 %v1774_v56  ;;  %v1790_v8 = vmul.f32 1.442695, %v1748_v5 }
 0x578   : > { %v3946_v20 = vpop.permute.xlu1 %1730  ;;  %2576 = vpow2.f32 %v1776_v59  ;;  %v1792_v14 = vmul.f32 1.442695, %v1749_v4  ;;  %v1753_v3 = vsub.f32 %v3828_v35, %v3937_v11 }
 0x579   : > { %v1754_v44 = vsub.f32 %v3681_v19, %v3946_v20  ;;  %v1755_v7 = vsub.f32 %v3684_v25, %v3946_v20  ;;  %2578 = vpow2.f32 %v1786_v10  ;;  %v1745_v25 = vsub.f32 %v3803_v23, %v1721_v53 }
 0x57a   : > { %2580 = vpow2.f32 %v1788_v12  ;;  %v1756_v55 = vsub.f32 %v3689_v34, %v3946_v20  ;;  %v1751_v34 = vsub.f32 %v3791_v47, %v3937_v11  ;;  %v1757_v40 = vsub.f32 %v4174_v6, %v3946_v20 }
 0x57b   : > { %v1802_v2 = vmul.f32 1.442695, %v1754_v44  ;;  %2582 = vpow2.f32 %v1778_v27  ;;  %v1804_v1 = vmul.f32 1.442695, %v1755_v7  ;;  %v1784_v0 = vmul.f32 1.442695, %v1745_v25 }
 0x57c   : > { %v3953_v13 = vpop.permute.xlu1 %1735  ;;  %2584 = vpow2.f32 %v1790_v8  ;;  %v1806_v58 = vmul.f32 1.442695, %v1756_v55  ;;  %v1758_v47 = vsub.f32 %v3811_v22, %v3946_v20  ;;  %v1796_v5 = vmul.f32 1.442695, %v1751_v34 }
 0x57d   : > { %v1762_v51 = vsub.f32 %v3687_v32, %v3953_v13  ;;  %v1763_v19 = vsub.f32 %v3695_v38, %v3953_v13  ;;  %2586 = vpow2.f32 %v1802_v2  ;;  %v1750_v32 = vsub.f32 %v3784_v41, %v3937_v11  ;;  %v4173_v38 = vld [vmem:[#allocation43_spill] sm:$0xff] }
 0x57e   : > { %2588 = vpow2.f32 %v1780_v26  ;;  %v1764_v23 = vsub.f32 %v4173_v38, %v3953_v13  ;;  %v1808_v10 = vmul.f32 1.442695, %v1757_v40  ;;  %v1759_v28 = vsub.f32 %v3815_v33, %v3946_v20 }
 0x57f   : > { %v2571_v63 = vpop.eup %2570  ;;  %v1818_v45 = vmul.f32 1.442695, %v1762_v51  ;;  %v1820_v37 = vmul.f32 1.442695, %v1763_v19  ;;  %2590 = vpow2.f32 %v1804_v1  ;;  %v1794_v52 = vmul.f32 1.442695, %v1750_v32 }
 0x580   : > { %v2573_v54 = vpop.eup %2572  ;;  %v1822_v15 = vmul.f32 1.442695, %v1764_v23  ;;  %v1765_v27 = vsub.f32 %v3705_v48, %v3953_v13  ;;  %v1798_v44 = vmul.f32 1.442695, %v1752_v18  ;;  %v1760_v35 = vsub.f32 %v3818_v16, %v3946_v20 }
 0x581   : > { %v1834_v24 = vadd.f32 %v2573_v54, %v2571_v63  ;;  %v2575_v43 = vpop.eup %2574  ;;  %2592 = vpow2.f32 %v1818_v45  ;;  %v1810_v11 = vmul.f32 1.442695, %v1758_v47  ;;  %v1800_v2 = vmul.f32 1.442695, %v1753_v3 }
 0x582   : > { %v2577_v53 = vpop.eup %2576  ;;  %2594 = vpow2.f32 %v1820_v37  ;;  %v1766_v9 = vsub.f32 %v3826_v60, %v3953_v13  ;;  %v1761_v48 = vsub.f32 %v3831_v42, %v3946_v20  ;;  %v1812_v1 = vmul.f32 1.442695, %v1759_v28 }
 0x583   : > { %v1835_v57 = vadd.f32 %v2575_v43, %v1834_v24  ;;  %v2579_v41 = vpop.eup %2578  ;;  %2596 = vpow2.f32 %v1782_v30  ;;  %v1824_v19 = vmul.f32 1.442695, %v1765_v27  ;;  %v1767_v16 = vsub.f32 %v3834_v31, %v3953_v13 }
 0x584   : > { %v2581_v56 = vpop.eup %2580  ;;  %2598 = vpow2.f32 %v1784_v0  ;;  %v1814_v63 = vmul.f32 1.442695, %v1760_v35  ;;  %v1768_v45 = vsub.f32 %v3840_v21, %v3953_v13  ;;  %v1826_v37 = vmul.f32 1.442695, %v1766_v9  ;;  %v1883_v9 = vld [vmem:[#allocation5] sm:$0xff] }
 0x585   : > { %v1836_v59 = vadd.f32 %v2577_v53, %v1835_v57  ;;  %v2583_v61 = vpop.eup %2582  ;;  %2600 = vpow2.f32 %v1792_v14  ;;  %v1843_v22 = vadd.f32 %v2581_v56, %v2579_v41  ;;  %v1816_v54 = vmul.f32 1.442695, %v1761_v48  ;;  %v1884_v48 = vld [vmem:[#allocation5 + $0x8] sm:$0xff] }
 0x586   : > { %2602 = vpow2.f32 %v1806_v58  ;;  %v2585_v50 = vpop.eup %2584  ;;  %v1769_v32 = vsub.f32 %v3848_v62, %v3953_v13  ;;  %v1828_v31 = vmul.f32 1.442695, %v1767_v16  ;;  %v1830_v14 = vmul.f32 1.442695, %v1768_v45  ;;  %v1710_v45 = vld [vmem:[#allocation4] sm:$0xff] }
 0x587   : > { %v1837_v12 = vadd.f32 %v2583_v61, %v1836_v59  ;;  %2604 = vpow2.f32 %v1794_v52  ;;  %v2587_v7 = vpop.eup %2586  ;;  %v1844_v4 = vadd.f32 %v2585_v50, %v1843_v22  ;;  %v4176_v16 = vsub.f32 %v3866_v39, %v3874_v49  ;;  %v1711_v39 = vld [vmem:[#allocation4 + $0x8] sm:$0xff] }
 0x588   : > { %2606 = vpow2.f32 %v1822_v15  ;;  %v2589_v8 = vpop.eup %2588  ;;  %v1832_v40 = vmul.f32 1.442695, %v1769_v32 }
 0x589   : > { %2608 = vpow2.f32 %v1796_v5  ;;  %v2591_v33 = vpop.eup %2590  ;;  %v1838_v26 = vadd.f32 %v2589_v8, %v1837_v12 }
 0x58a   : > { %2610 = vpow2.f32 %v1808_v10  ;;  %v1852_v60 = vadd.f32 %v2591_v33, %v2587_v7 }
 0x58b   : > { %v2593_v51 = vpop.eup %2592  ;;  %2612 = vpow2.f32 %v1798_v44 }
 0x58c   : > { %v2595_v25 = vpop.eup %2594  ;;  %2614 = vpow2.f32 %v1810_v11 }
 0x58d   : > { %v2597_v55 = vpop.eup %2596  ;;  %2616 = vpow2.f32 %v1800_v2  ;;  %v1861_v53 = vadd.f32 %v2595_v25, %v2593_v51  ;;  %v1704_v25 = vmul.f32 1.442695, %v4176_v16 }
 0x58e   : > { %v2599_v42 = vpop.eup %2598  ;;  %v1839_v20 = vadd.f32 %v2597_v55, %v1838_v26  ;;  %2618 = vpow2.f32 %v1812_v1 }
 0x58f   : > { %v2601_v30 = vpop.eup %2600  ;;  %2620 = vpow2.f32 %v1824_v19 }
 0x590   : > { %v2603_v38 = vpop.eup %2602  ;;  %v1840_v23 = vadd.f32 %v2599_v42, %v1839_v20  ;;  %v1845_v0 = vadd.f32 %v2601_v30, %v1844_v4  ;;  %2622 = vpow2.f32 %v1814_v63  ;;  %v4178_v4 = vld [vmem:[#allocation45_spill] sm:$0xff]  ;;  %v4180_v42 = vld [vmem:[#allocation46_spill] sm:$0xff]  ;;  %v4181_v20 = vld [vmem:[#allocation47_spill] sm:$0xff] }
 0x591   : > { %v2605_v24 = vpop.eup %2604  ;;  %v1853_v43 = vadd.f32 %v2603_v38, %v1852_v60  ;;  %2624 = vpow2.f32 %v1826_v37 }
 0x592   : > { %v2607_v21 = vpop.eup %2606  ;;  %1841 = vadd.xlane.f32.xlu1 %v1840_v23  ;;  %v1846_v34 = vadd.f32 %v2605_v24, %v1845_v0  ;;  %2626 = vpow2.f32 %v1816_v54  ;;  %v4182_v54 = vsub.f32 %v4180_v42, %v4181_v20  ;;  %v1712_v0 = vld [vmem:[#allocation4 + $0x10] sm:$0xff] }
 0x593   : > { %v2609_v6 = vpop.eup %2608  ;;  %2628 = vpow2.f32 %v1828_v31  ;;  %v1862_v52 = vadd.f32 %v2607_v21, %v1861_v53  ;;  %v1885_v24 = vld [vmem:[#allocation5 + $0x10] sm:$0xff] }
 0x594   : > { %v2611_v58 = vpop.eup %2610  ;;  %v1847_v62 = vadd.f32 %v2609_v6, %v1846_v34  ;;  %2630 = vpow2.f32 %v1830_v14  ;;  %v1708_v30 = vmul.f32 1.442695, %v4182_v54 }
 0x595   : > { %v2613_v13 = vpop.eup %2612  ;;  %v1854_v57 = vadd.f32 %v2611_v58, %v1853_v43  ;;  %2632 = vpow2.f32 %v1832_v40  ;;  %v1713_v40 = vld [vmem:[#allocation4 + $0x18] sm:$0xff] }
 0x596   : > { %v2615_v41 = vpop.eup %2614  ;;  %v1848_v18 = vadd.f32 %v2613_v13, %v1847_v62 }
 0x597   : > { %v2617_v56 = vpop.eup %2616  ;;  %v1855_v15 = vadd.f32 %v2615_v41, %v1854_v57  ;;  %v1886_v57 = vld [vmem:[#allocation5 + $0x18] sm:$0xff] }
 0x598   : > { %v2619_v59 = vpop.eup %2618  ;;  %v1849_v47 = vadd.f32 %v2617_v56, %v1848_v18 }
 0x599   : > { %v2621_v61 = vpop.eup %2620  ;;  %v1856_v3 = vadd.f32 %v2619_v59, %v1855_v15 }
 0x59a   : > { %v2623_v5 = vpop.eup %2622  ;;  %1850 = vadd.xlane.f32.xlu0 %v1849_v47  ;;  %v1863_v10 = vadd.f32 %v2621_v61, %v1862_v52  ;;  %v1987_v47 = vld [vmem:[#allocation12] sm:$0xff] (!%p2330_p2) }
 0x59b   : > { %v2625_v12 = vpop.eup %2624  ;;  %v1857_v28 = vadd.f32 %v2623_v5, %v1856_v3  ;;  %v1988_v3 = vld [vmem:[#allocation12 + $0x8] sm:$0xff] (!%p2330_p2)  ;;  %vm2003_vm3 = vcmp.ne.f32.partialorder (!%p2330_p2), %v1987_v47, 0.0 }
 0x59c   : > { %v2627_v50 = vpop.eup %2626  ;;  %v1864_v27 = vadd.f32 %v2625_v12, %v1863_v10  ;;  %v1967_v12 = vld [vmem:[#allocation3] sm:$0xff] (!%p2330_p2)  ;;  %vm2004_vm4 = vcmp.ne.f32.partialorder (!%p2330_p2), %v1988_v3, 0.0 }
 0x59d   : > { %v2629_v44 = vpop.eup %2628  ;;  %v1858_v7 = vadd.f32 %v2627_v50, %v1857_v28 }
 0x59e   : > { %1944 = vadd.xlane.f32.xlu0 %v3856_v46  ;;  %v1865_v22 = vadd.f32 %v2629_v44, %v1864_v27  ;;  %v2631_v35 = vpop.eup %2630  ;;  %v4175_v46 = vsub.f32 %v3861_v29, %v3864_v17  ;;  %v1968_v44 = vld [vmem:[#allocation3 + $0x8] sm:$0xff] (!%p2330_p2) }
 0x59f   : > { %1859 = vadd.xlane.f32.xlu1 %v1858_v7  ;;  %v2633_v8 = vpop.eup %2632  ;;  %v1989_v7 = vld [vmem:[#allocation12 + $0x10] sm:$0xff] (!%p2330_p2) }
 0x5a0   : > { %v1866_v11 = vadd.f32 %v2631_v35, %v1865_v22  ;;  %v1702_v19 = vmul.f32 1.442695, %v4175_v46  ;;  %vm2005_vm5 = vcmp.ne.f32.partialorder (!%p2330_p2), %v1989_v7, 0.0 }
 0x5a2   : > { %v1867_v2 = vadd.f32 %v2633_v8, %v1866_v11  ;;  %2634 = vpow2.f32 %v1702_v19  ;;  %v1990_v8 = vld [vmem:[#allocation12 + $0x18] sm:$0xff] (!%p2330_p2) }
 0x5a3   : > { %2636 = vpow2.f32 %v1704_v25  ;;  %v1970_v19 = vld [vmem:[#allocation3 + $0x18] sm:$0xff] (!%p2330_p2)  ;;  %vm2006_vm6 = vcmp.ne.f32.partialorder (!%p2330_p2), %v1990_v8, 0.0 }
 0x5a4   : > { %1868 = vadd.xlane.f32.xlu1 %v1867_v2 }
 0x5a8   : > { %1953 = vadd.xlane.f32.xlu1 %v3858_v36  ;;  %v4177_v36 = vld [vmem:[#allocation44_spill] sm:$0xff] }
 0x5a9   : > { %v4179_v63 = vsub.f32 %v4177_v36, %v4178_v4 }
 0x5ab   : > { %v1706_v55 = vmul.f32 1.442695, %v4179_v63 }
 0x5ac   : > { %v2635_v60 = vpop.eup %2634 }
 0x5ad   : > { %2638 = vpow2.f32 %v1706_v55  ;;  %v1714_v37 = vmul.f32 %v2635_v60, %v1710_v45  ;;  %v2637_v32 = vpop.eup %2636 }
 0x5ae   : > { %v1927_v33 = vpop.xlane.xlu1 %1926  ;;  %2640 = vpow2.f32 %v1708_v30  ;;  %v1715_v49 = vmul.f32 %v2637_v32, %v1711_v39 }
 0x5af   : > { %v1955_v26 = vadd.f32 %v1927_v33, %v1883_v9 }
 0x5b1   : > { %1959 = vst.msk [vmem:[#allocation5] sm:$0xff] %vm1874_vm2, %v1955_v26  ;;  %v1969_v26 = vld [vmem:[#allocation3 + $0x10] sm:$0xff] (!%p2330_p2) }
 0x5b2   : > { %v1936_v1 = vpop.xlane.xlu1 %1935 }
 0x5b3   : > { %v1956_v51 = vadd.f32 %v1936_v1, %v1884_v48 }
 0x5b5   : > { %1960 = vst.msk [vmem:[#allocation5 + $0x8] sm:$0xff] %vm1874_vm2, %v1956_v51 }
 0x5b7   : > { %v2639_v38 = vpop.eup %2638 }
 0x5b8   : > { %v1716_v43 = vmul.f32 %v2639_v38, %v1712_v0  ;;  %v2641_v53 = vpop.eup %2640  ;;  %v1991_v61 = vld [vmem:[#allocation5] sm:$0xff] (!%p2330_p2) }
 0x5b9   : > { %v1717_v58 = vmul.f32 %v2641_v53, %v1713_v40  ;;  %v1995_v27 = vmul.f32 (!%p2330_p2), %v1991_v61, %v1987_v47 }
 0x5bc   : > { %v1992_v5 = vld [vmem:[#allocation5 + $0x8] sm:$0xff] (!%p2330_p2) }
 0x5bd   : > { %v1996_v11 = vmul.f32 (!%p2330_p2), %v1992_v5, %v1988_v3 }
 0x61f   : > { %v1842_v29 = vpop.xlane.xlu1 %1841 }
 0x620   : > { %v1870_v17 = vadd.f32 %v1842_v29, %v1714_v37 }
 0x622   : > { %1875 = vst.msk [vmem:[#allocation4] sm:$0xff] %vm1874_vm2, %v1870_v17 }
 0x627   : > { %v1851_v31 = vpop.xlane.xlu0 %1850 }
 0x628   : > { %v1871_v23 = vadd.f32 %v1851_v31, %v1715_v49 }
 0x629   : > { %v1971_v52 = vld [vmem:[#allocation4] sm:$0xff] (!%p2330_p2) }
 0x62a   : > { %1876 = vst.msk [vmem:[#allocation4 + $0x8] sm:$0xff] %vm1874_vm2, %v1871_v23  ;;  %2642 = vlog2.f32 (!%p2330_p2), %v1971_v52 }
 0x62b   : > { %v1945_v14 = vpop.xlane.xlu0 %1944 }
 0x62c   : > { %v1860_v21 = vpop.xlane.xlu1 %1859  ;;  %v1957_v34 = vadd.f32 %v1945_v14, %v1885_v24 }
 0x62d   : > { %v1872_v6 = vadd.f32 %v1860_v21, %v1716_v43 }
 0x62e   : > { %1961 = vst.msk [vmem:[#allocation5 + $0x10] sm:$0xff] %vm1874_vm2, %v1957_v34 }
 0x62f   : > { %1877 = vst.msk [vmem:[#allocation4 + $0x10] sm:$0xff] %vm1874_vm2, %v1872_v6 }
 0x631   : > { %v1869_v62 = vpop.xlane.xlu1 %1868  ;;  %v1972_v56 = vld [vmem:[#allocation4 + $0x8] sm:$0xff] (!%p2330_p2) }
 0x632   : > { %v1873_v13 = vadd.f32 %v1869_v62, %v1717_v58  ;;  %1966 = sbr.rel (%p2330_p2) target bundleno = 1615 (0x64f), region = 116  ;;  %2644 = vlog2.f32 (!%p2330_p2), %v1972_v56 }
 0x634   : > { %1878 = vst.msk [vmem:[#allocation4 + $0x18] sm:$0xff] %vm1874_vm2, %v1873_v13  ;;  %v2643_v10 = vpop.eup (!%p2330_p2), %2642 }
 0x635   : > { %v1954_v41 = vpop.xlane.xlu1 %1953  ;;  %v1976_v50 = vmul.f32 (!%p2330_p2), 0.6931472, %v2643_v10  ;;  %v1993_v22 = vld [vmem:[#allocation5 + $0x10] sm:$0xff] (!%p2330_p2) }
 0x636   : > { %v1958_v18 = vadd.f32 %v1954_v41, %v1886_v57  ;;  %v1973_v15 = vld [vmem:[#allocation4 + $0x10] sm:$0xff] (!%p2330_p2)  ;;  %v1997_v46 = vmul.f32 (!%p2330_p2), %v1993_v22, %v1989_v7 }
 0x637   : > { %2646 = vlog2.f32 (!%p2330_p2), %v1973_v15  ;;  %v1983_v33 = vadd.f32 (!%p2330_p2), %v1976_v50, %v1967_v12 }
 0x638   : > { %1962 = vst.msk [vmem:[#allocation5 + $0x18] sm:$0xff] %vm1874_vm2, %v1958_v18 }
 0x639   : > { %v1999_v16 = vsub.f32 %v1983_v33, %v1995_v27 }
 0x63b   : > { %v1974_v59 = vld [vmem:[#allocation4 + $0x18] sm:$0xff]  ;;  %v2007_v55 = vsel %vm2003_vm3, %v1999_v16, 0.0 }
 0x63c   : > { %2648 = vlog2.f32 %v1974_v59  ;;  %v2645_v28 = vpop.eup %2644  ;;  %2011 = vst.msk [vmem:[#allocation23] sm:$0xff] %vm1874_vm2, %v2007_v55 }
 0x63d   : > { %v1978_v35 = vmul.f32 0.6931472, %v2645_v28 }
 0x63f   : > { %v1994_v2 = vld [vmem:[#allocation5 + $0x18] sm:$0xff]  ;;  %v1984_v1 = vadd.f32 %v1978_v35, %v1968_v44 }
 0x640   : > { %v1998_v36 = vmul.f32 %v1994_v2, %v1990_v8 }
 0x641   : > { %v2647_v9 = vpop.eup %2646  ;;  %v2000_v4 = vsub.f32 %v1984_v1, %v1996_v11 }
 0x642   : > { %v1980_v51 = vmul.f32 0.6931472, %v2647_v9 }
 0x643   : > { %v2008_v45 = vsel %vm2004_vm4, %v2000_v4, 0.0 }
 0x644   : > { %v1985_v63 = vadd.f32 %v1980_v51, %v1969_v26  ;;  %2012 = vst.msk [vmem:[#allocation23 + $0x8] sm:$0xff] %vm1874_vm2, %v2008_v45 }
 0x646   : > { %v2649_v48 = vpop.eup %2648  ;;  %v2001_v37 = vsub.f32 %v1985_v63, %v1997_v46 }
 0x647   : > { %v1982_v25 = vmul.f32 0.6931472, %v2649_v48 }
 0x648   : > { %v2009_v20 = vsel %vm2005_vm5, %v2001_v37, 0.0 }
 0x649   : > { %v1986_v60 = vadd.f32 %v1982_v25, %v1970_v19  ;;  %2013 = vst.msk [vmem:[#allocation23 + $0x10] sm:$0xff] %vm1874_vm2, %v2009_v20 }
 0x64b   : > { %v2002_v42 = vsub.f32 %v1986_v60, %v1998_v36 }
 0x64d   : > { %v2010_v54 = vsel %vm2006_vm6, %v2002_v42, 0.0 }
 0x64e   : > { %2014 = vst.msk [vmem:[#allocation23 + $0x18] sm:$0xff] %vm1874_vm2, %v2010_v54 }
 0x64f PF: > { %s4184_s4 = sld [smem:[#allocation37_spill]]  ;;  %s3094_s29 = smov [#allocation23]  }
 0x650   : > { %s2024_s18 = sshll.u32 %s3094_s29, 4  ;;  %s2025_s18 = int_to_ptr.vmem [resolvable:$true] %s2024_s18 }
 0x651   : > { %s2964_s24 = scalar_lea.vmem %s2025_s18, 512  ;;  %p2971_p4 = scmp.lt.s32.totalorder %s2025_s18, %s2025_s18 }
 0x652   : > { %p2965_p1 = scmp.ne.s32.totalorder %s2025_s18, %s2964_s24  ;;  %p2972_p13 = scmp.lt.s32.totalorder %s2964_s24, %s2964_s24 }
 0x654   : > { %p2973_p9 = por %p2972_p13, %p2971_p4 }
 0x655   : > { %p2484_p3 = scmp.eq.s32.totalorder %s4184_s4, 2 }
 0x657   : > { %p2966_p6 = pnand %p2965_p1, %p2484_p3 }
 0x659   : > { %p2967_p8 = pneg %p2966_p6 }
 0x65b   : > { %p2974_p10 = pnand %p2973_p9, %p2967_p8 }
 0x65d   : > { %2977 = shalt.err (!%p2974_p10)
}
 0x65e   : > { %s4185_s16 = sld [smem:[#allocation53_spill]] }
 0x664   : > { %s2978_s13 = scalar_lea.hbm %s4185_s16, 512 }
 0x665   : > { %p2979_p7 = scmp.ne.s32.totalorder %s4185_s16, %s2978_s13  ;;  %p2984_p12 = scmp.lt.u32.totalorder %s2978_s13, %s4185_s16 }
 0x667   : > { %p2980_p0 = pnand %p2979_p7, %p2484_p3 }
 0x669   : > { %p2981_p5 = pneg %p2980_p0 }
 0x66b   : > { %p2986_p11 = pnand %p2984_p12, %p2981_p5 }
 0x66d   : > { %2989 = shalt.err (!%p2986_p11)
}
 0x66e   : > { %s3095_s26 = smov 128   ;;  %s3096_s28 = smov 8  }
 0x66f   : > { %2429 = dma.vmem_to_hbm [thread:$0]  (%p2484_p3), %s2025_s18, 512, %s4185_s16, [#allocation8], %s3095_s26, %s3095_s26, %s3096_s28  }
 0x670   : > { %3047 = dma.done.wait (%p2484_p3), [#allocation8], 512  }
 0x671   : > { %3049 = vsyncadd (%p2484_p3), [#allocation8], 4294966784 }
 0x672 PF: > { %s4186_s20 = sld [smem:[#allocation36_spill]]  ;;  %s4187_s17 = sld [smem:[#allocation33_spill]] }
 0x673   : > { %s4188_s18 = sld [smem:[#allocation34_spill]]  ;;  %s4189_s19 = sld [smem:[#allocation41_spill]] }
 0x674   : > { %s4190_s11 = sld [smem:[#allocation39_spill]] }
 0x678   : > { %s27_s22 = sadd.s32 1, %s4186_s20   ;;  %s4191_s20 = smov %s3068_s21 }
 0x679   : > { %p24_p2 = scmp.ge.s32.totalorder %s27_s22, 5  }
 0x67a   : > { %s4192_s21 = smov %s4190_s11 }
 0x67b   :  { %26 = sbr.rel (!%p24_p2) target bundleno = 15 (0xf), region = 166 }
 0x682   :  { %2040 = vsyncpa [#allocation7], 1 }
 0x683   :  { %2042 = vsyncpa [#allocation7 + $0x1], 1 }
 0x684   :  { %2043 = vsyncpa [#allocation10], 1 }
 0x685   :  { %2044 = vsyncpa [#allocation14], 1 }
 0x686   :  { %2045 = vsyncpa [#allocation17], 1 }
 0x687   :  { %2046 = vsyncpa [#allocation20], 1 }
 0x688   :  { %2047 = vsyncpa [#allocation8], 1 }
 0x689   :  { %2049 = vsyncpa [#allocation8 + $0x1], 1 }

</bundles_post_ra>
